<compile_context>
chip_gen: v6e
topology: v6e:2x2x1
jax: 0.10.0
libtpu: 0.0.40
codegen_flags: <defaults>
</compile_context>

<pallas_src>
import math
from functools import partial

import jax
import jax.numpy as jnp
from jax.experimental import pallas as pl
from jax.experimental.pallas import tpu as pltpu


def _classifier_kernel(x_ref, w_ref, b_ref, o_ref, *,
                       dils, pads, pmax, w_flat, span):
    """One (batch, row-tile, cin-chunk) grid step.

    x_ref: (cin_chunk, tile_len)   bf16  flattened padded rows incl. halo
    w_ref: (B*9, Cout, cin_chunk)  bf16  tap-major weights for this Cin chunk
    b_ref: (Cout, 1)               f32   bias summed over branches
    o_ref: (Cout, span)            f32   flattened output rows (resident across k)
    """
    contrib = None
    t = 0
    for d, p in zip(dils, pads):
        base = pmax - p
        for kh in range(3):
            row_off = (base + kh * d) * w_flat
            for kw in range(3):
                start = row_off + base + kw * d          # static flat offset
                # Direct per-tap MXU matmul from a contiguous lane slice —
                # no im2col copy, no cast, f32 accumulation on the MXU.
                c = jnp.dot(w_ref[t], x_ref[:, start:start + span],
                            preferred_element_type=jnp.float32)
                contrib = c if contrib is None else contrib + c
                t += 1

    k = pl.program_id(2)                                  # Cin-chunk reduction axis

    @pl.when(k == 0)
    def _():
        o_ref[...] = contrib + b_ref[...]                 # init with bias

    @pl.when(k > 0)
    def _():
        o_ref[...] += contrib                             # accumulate over chunks


def _choose_tiling(H_out, W_out, W, Cin, Cout, B, pmax, halo, budget_bytes):
    """Pick (row_block, W_flat, cin_chunk, vmem_need) as large as the budget allows."""
    w_pad_min = max(W + pmax, W_out + halo)
    row_cands = [r for r in range(H_out, 0, -1) if H_out % r == 0]
    cin_cands = [Cin] + [c for c in range(128 * ((Cin - 1) // 128), 0, -128)
                         if Cin % c == 0]                 # Cin itself or 128-multiples
    last = None
    for r in row_cands:
        # Lane-friendly: full 128 alignment when the padded row is wide enough,
        # otherwise just enough that row_block*W_flat is a multiple of 128.
        align = 128 if w_pad_min >= 128 else 128 // math.gcd(128, r)
        w_flat = ((w_pad_min + align - 1) // align) * align
        tile_len = (r + halo + 1) * w_flat
        co = max(Cout, 8)                                 # sublane padding in VMEM
        for cc in cin_cands:
            need = 2 * (cc * tile_len * 2                 # bf16 x tile, double-buffered
                        + B * 9 * co * cc * 2             # bf16 weight chunk
                        + co * r * w_flat * 4)            # f32 output tile
            last = (r, w_flat, cc, need)
            if need <= budget_bytes:
                return last
    return last                                           # smallest candidate


def classifier_module_forward(x_nchw, weights, biases, dilation_series,
                              padding_series, *, mxu_dtype=jnp.bfloat16,
                              vmem_budget_bytes=40 * 1024 * 1024):
    """x: (N, Cin, H, W); weights: (B, 3, 3, Cin, Cout) HWIO; biases: (B, Cout)."""
    N, Cin, H, W = map(int, x_nchw.shape)
    B = len(dilation_series)
    Cout = int(weights.shape[-1])
    assert weights.shape == (B, 3, 3, Cin, Cout)
    assert biases.shape == (B, Cout)

    dils = tuple(int(d) for d in dilation_series)
    pads = tuple(int(p) for p in padding_series)

    out_hw = {(H + 2 * p - 2 * d, W + 2 * p - 2 * d) for d, p in zip(dils, pads)}
    assert len(out_hw) == 1, "branch output shapes must match to be summed"
    H_out, W_out = out_hw.pop()
    assert H_out >= 1 and W_out >= 1

    pmax = max(pads)
    # Extra padded rows a row tile needs below its first output row (all branches).
    halo = max(pmax - p + 2 * d for d, p in zip(dils, pads))

    row_block, W_flat, cin_chunk, vmem_need = _choose_tiling(
        H_out, W_out, W, Cin, Cout, B, pmax, halo, vmem_budget_bytes)
    n_row_tiles = H_out // row_block
    n_cin_chunks = Cin // cin_chunk
    rows_per_tile = row_block + halo + 1       # +1 slack row: wrapped tap slices stay in-bounds
    tile_len = rows_per_tile * W_flat
    span = row_block * W_flat

    # Geometry safety for arbitrary (dils, pads) with matching branch outputs:
    total_rows = H_out + halo + 1              # padded rows the tiling ever touches
    assert total_rows >= pmax + H + 1          # bottom pad is non-negative
    assert W_flat >= W_out + halo and halo <= W_flat   # wrapped reads only hit stripped cols

    # Pad ONCE, already in the MXU dtype (bf16 halves activation HBM traffic),
    # spatially flattened so every tap is a contiguous, statically addressed lane slice.
    x_pad = jnp.pad(x_nchw.astype(mxu_dtype),
                    ((0, 0), (0, 0),
                     (pmax, total_rows - pmax - H),
                     (pmax, W_flat - pmax - W)))
    x_flat = x_pad.reshape(N, Cin, total_rows * W_flat)

    if n_row_tiles == 1:
        # Whole image per grid step: zero halo duplication in HBM.
        x_tiles = x_flat.reshape(N, 1, Cin, tile_len)
    else:
        # TODO(synk): replace the halo-duplicated stack with a manual overlapping-
        # window DMA (memory_space=pl.ANY + make_async_copy); with the large
        # row_block chosen above the duplication factor is already small.
        x_tiles = jnp.stack(
            [x_flat[:, :, i * row_block * W_flat:
                          i * row_block * W_flat + tile_len]
             for i in range(n_row_tiles)], axis=1)

    # Weights tap-major with Cin LAST: a Cin chunk is a plain contiguous Blocked
    # slice of the last axis (contiguous weight DMA per reduction step).
    w_taps = jnp.transpose(weights, (0, 1, 2, 4, 3)).reshape(B * 9, Cout, Cin)
    w_taps = w_taps.astype(mxu_dtype)
    bias_total = jnp.sum(biases, axis=0).reshape(Cout, 1).astype(jnp.float32)

    kernel = partial(_classifier_kernel, dils=dils, pads=pads, pmax=pmax,
                     w_flat=W_flat, span=span)

    # Computed VMEM limit (capped so it is also valid on v7x's 64 MiB per-TC VMEM).
    vmem_limit = int(min(max(2 * vmem_need, 32 * 1024 * 1024), 56 * 1024 * 1024))

    out_flat = pl.pallas_call(
        kernel,
        out_shape=jax.ShapeDtypeStruct((N, Cout, H_out * W_flat), jnp.float32),
        grid_spec=pltpu.PrefetchScalarGridSpec(
            num_scalar_prefetch=0,
            grid=(N, n_row_tiles, n_cin_chunks),
            in_specs=[
                pl.BlockSpec((None, None, cin_chunk, tile_len),
                             lambda n, i, k: (n, i, k, 0)),
                pl.BlockSpec((B * 9, Cout, cin_chunk),
                             lambda n, i, k: (0, 0, k)),
                pl.BlockSpec((Cout, 1), lambda n, i, k: (0, 0)),
            ],
            out_specs=pl.BlockSpec((None, Cout, span),
                                   lambda n, i, k: (n, 0, i)),
        ),
        compiler_params=pltpu.CompilerParams(
            dimension_semantics=("parallel", "parallel", "arbitrary"),
            vmem_limit_bytes=vmem_limit,
        ),
    )(x_tiles, w_taps, bias_total)

    # Free reshape + strip the horizontal-pad columns (tiny: num_classes channels).
    return out_flat.reshape(N, Cout, H_out, W_flat)[:, :, :, :W_out]


def _reference_forward(x_nchw, weights, biases, dilation_series, padding_series):
    """Pure-JAX reference mirroring the PyTorch forward (sum of dilated convs)."""
    out = None
    for bi, (d, p) in enumerate(zip(dilation_series, padding_series)):
        w_oihw = jnp.transpose(weights[bi], (3, 2, 0, 1))        # (Cout, Cin, 3, 3)
        y = jax.lax.conv_general_dilated(
            x_nchw, w_oihw, window_strides=(1, 1), padding=((p, p), (p, p)),
            rhs_dilation=(d, d), dimension_numbers=("NCHW", "OIHW", "NCHW"),
            preferred_element_type=jnp.float32)
        y = y + biases[bi].astype(jnp.float32)[None, :, None, None]
        out = y if out is None else out + y
    return out


if __name__ == "__main__":
    inplanes = 8
    num_classes = 4
    dilation_series = [1, 2, 4]
    padding_series = [1, 2, 4]
    B = len(dilation_series)
    N, H, W = 2, 16, 16

    key = jax.random.PRNGKey(0)
    kx, kw_, kb = jax.random.split(key, 3)
    x = jax.random.normal(kx, (N, inplanes, H, W), dtype=jnp.float32)
    weights = 0.01 * jax.random.normal(
        kw_, (B, 3, 3, inplanes, num_classes), dtype=jnp.float32)
    bound = 1.0 / jnp.sqrt(jnp.float32(inplanes * 9))
    biases = jax.random.uniform(kb, (B, num_classes), minval=-bound,
                                maxval=bound, dtype=jnp.float32)

    out = jax.block_until_ready(
        classifier_module_forward(x, weights, biases,
                                  dilation_series, padding_series))
    assert out.shape == (N, num_classes, H, W), out.shape

    # Tight check: reference fed the same bf16-quantized MXU operands.
    ref_q = jax.block_until_ready(
        _reference_forward(x.astype(jnp.bfloat16), weights.astype(jnp.bfloat16),
                           biases, dilation_series, padding_series))
    assert jnp.allclose(out, ref_q, atol=1e-4, rtol=1e-4), \
        float(jnp.max(jnp.abs(out - ref_q)))

    # Loose check: pure-f32 PyTorch-equivalent forward (difference is only the
    # bf16 quantization of the matmul operands).
    ref_f32 = jax.block_until_ready(
        _reference_forward(x, weights, biases, dilation_series, padding_series))
    assert jnp.allclose(out, ref_f32, atol=2e-2, rtol=2e-2), \
        float(jnp.max(jnp.abs(out - ref_f32)))

    print("KERNEL_OK")
</pallas_src>

<mosaic_0001>
module attributes {stable_mosaic.version = 11 : i64} {
  func.func @_classifier_kernel(%arg0: i32, %arg1: i32, %arg2: i32, %arg3: memref<1x1x8x600xbf16, #tpu.memory_space<vmem>>, %arg4: memref<27x4x8xbf16, #tpu.memory_space<vmem>>, %arg5: memref<4x1xf32, #tpu.memory_space<vmem>>, %arg6: memref<1x4x384xf32, #tpu.memory_space<vmem>>) attributes {dimension_semantics = [#tpu.dimension_semantics<parallel>, #tpu.dimension_semantics<parallel>, #tpu.dimension_semantics<arbitrary>], iteration_bounds = array<i64: 2, 1, 1>, scalar_prefetch = 0 : i64, scratch_operands = 0 : i64, tpu.core_type = #tpu.core_type<tc>, window_params = [{transform_indices = @transform_0, window_bounds = array<i64: 1, 1, 8, 600>}, {transform_indices = @transform_1, window_bounds = array<i64: 27, 4, 8>}, {pipeline_mode = #tpu.pipeline_mode<synchronous>, transform_indices = @transform_2, window_bounds = array<i64: 4, 1>}, {transform_indices = @transform_3, window_bounds = array<i64: 1, 4, 384>}]} {
    %c0 = arith.constant 0 : index
    %c0_0 = arith.constant 0 : index
    %c0_1 = arith.constant 0 : index
    %0 = vector.load %arg4[%c0, %c0_0, %c0_1] : memref<27x4x8xbf16, #tpu.memory_space<vmem>>, vector<1x4x8xbf16>
    %1 = vector.shape_cast %0 : vector<1x4x8xbf16> to vector<4x8xbf16>
    %c0_2 = arith.constant 0 : index
    %c0_3 = arith.constant 0 : index
    %c0_4 = arith.constant 0 : index
    %c75 = arith.constant 75 : index
    %2 = vector.load %arg3[%c0_2, %c0_3, %c0_4, %c75] : memref<1x1x8x600xbf16, #tpu.memory_space<vmem>>, vector<1x1x8x384xbf16>
    %3 = vector.shape_cast %2 : vector<1x1x8x384xbf16> to vector<8x384xbf16>
    %cst = arith.constant dense<0.000000e+00> : vector<4x384xf32>
    %4 = tpu.matmul %1, %3, %cst {dimension_numbers = #tpu.dot_dimension_numbers<[1], [0], [0], [1], [0, 0, 1, 1], [], []>} : vector<4x8xbf16>, vector<8x384xbf16>, vector<4x384xf32> -> vector<4x384xf32>
    %c1 = arith.constant 1 : index
    %c0_5 = arith.constant 0 : index
    %c0_6 = arith.constant 0 : index
    %5 = vector.load %arg4[%c1, %c0_5, %c0_6] : memref<27x4x8xbf16, #tpu.memory_space<vmem>>, vector<1x4x8xbf16>
    %6 = vector.shape_cast %5 : vector<1x4x8xbf16> to vector<4x8xbf16>
    %c0_7 = arith.constant 0 : index
    %c0_8 = arith.constant 0 : index
    %c0_9 = arith.constant 0 : index
    %c76 = arith.constant 76 : index
    %7 = vector.load %arg3[%c0_7, %c0_8, %c0_9, %c76] : memref<1x1x8x600xbf16, #tpu.memory_space<vmem>>, vector<1x1x8x384xbf16>
    %8 = vector.shape_cast %7 : vector<1x1x8x384xbf16> to vector<8x384xbf16>
    %cst_10 = arith.constant dense<0.000000e+00> : vector<4x384xf32>
    %9 = tpu.matmul %6, %8, %cst_10 {dimension_numbers = #tpu.dot_dimension_numbers<[1], [0], [0], [1], [0, 0, 1, 1], [], []>} : vector<4x8xbf16>, vector<8x384xbf16>, vector<4x384xf32> -> vector<4x384xf32>
    %10 = arith.addf %4, %9 : vector<4x384xf32>
    %c2 = arith.constant 2 : index
    %c0_11 = arith.constant 0 : index
    %c0_12 = arith.constant 0 : index
    %11 = vector.load %arg4[%c2, %c0_11, %c0_12] : memref<27x4x8xbf16, #tpu.memory_space<vmem>>, vector<1x4x8xbf16>
    %12 = vector.shape_cast %11 : vector<1x4x8xbf16> to vector<4x8xbf16>
    %c0_13 = arith.constant 0 : index
    %c0_14 = arith.constant 0 : index
    %c0_15 = arith.constant 0 : index
    %c77 = arith.constant 77 : index
    %13 = vector.load %arg3[%c0_13, %c0_14, %c0_15, %c77] : memref<1x1x8x600xbf16, #tpu.memory_space<vmem>>, vector<1x1x8x384xbf16>
    %14 = vector.shape_cast %13 : vector<1x1x8x384xbf16> to vector<8x384xbf16>
    %cst_16 = arith.constant dense<0.000000e+00> : vector<4x384xf32>
    %15 = tpu.matmul %12, %14, %cst_16 {dimension_numbers = #tpu.dot_dimension_numbers<[1], [0], [0], [1], [0, 0, 1, 1], [], []>} : vector<4x8xbf16>, vector<8x384xbf16>, vector<4x384xf32> -> vector<4x384xf32>
    %16 = arith.addf %10, %15 : vector<4x384xf32>
    %c3 = arith.constant 3 : index
    %c0_17 = arith.constant 0 : index
    %c0_18 = arith.constant 0 : index
    %17 = vector.load %arg4[%c3, %c0_17, %c0_18] : memref<27x4x8xbf16, #tpu.memory_space<vmem>>, vector<1x4x8xbf16>
    %18 = vector.shape_cast %17 : vector<1x4x8xbf16> to vector<4x8xbf16>
    %c0_19 = arith.constant 0 : index
    %c0_20 = arith.constant 0 : index
    %c0_21 = arith.constant 0 : index
    %c99 = arith.constant 99 : index
    %19 = vector.load %arg3[%c0_19, %c0_20, %c0_21, %c99] : memref<1x1x8x600xbf16, #tpu.memory_space<vmem>>, vector<1x1x8x384xbf16>
    %20 = vector.shape_cast %19 : vector<1x1x8x384xbf16> to vector<8x384xbf16>
    %cst_22 = arith.constant dense<0.000000e+00> : vector<4x384xf32>
    %21 = tpu.matmul %18, %20, %cst_22 {dimension_numbers = #tpu.dot_dimension_numbers<[1], [0], [0], [1], [0, 0, 1, 1], [], []>} : vector<4x8xbf16>, vector<8x384xbf16>, vector<4x384xf32> -> vector<4x384xf32>
    %22 = arith.addf %16, %21 : vector<4x384xf32>
    %c4 = arith.constant 4 : index
    %c0_23 = arith.constant 0 : index
    %c0_24 = arith.constant 0 : index
    %23 = vector.load %arg4[%c4, %c0_23, %c0_24] : memref<27x4x8xbf16, #tpu.memory_space<vmem>>, vector<1x4x8xbf16>
    %24 = vector.shape_cast %23 : vector<1x4x8xbf16> to vector<4x8xbf16>
    %c0_25 = arith.constant 0 : index
    %c0_26 = arith.constant 0 : index
    %c0_27 = arith.constant 0 : index
    %c100 = arith.constant 100 : index
    %25 = vector.load %arg3[%c0_25, %c0_26, %c0_27, %c100] : memref<1x1x8x600xbf16, #tpu.memory_space<vmem>>, vector<1x1x8x384xbf16>
    %26 = vector.shape_cast %25 : vector<1x1x8x384xbf16> to vector<8x384xbf16>
    %cst_28 = arith.constant dense<0.000000e+00> : vector<4x384xf32>
    %27 = tpu.matmul %24, %26, %cst_28 {dimension_numbers = #tpu.dot_dimension_numbers<[1], [0], [0], [1], [0, 0, 1, 1], [], []>} : vector<4x8xbf16>, vector<8x384xbf16>, vector<4x384xf32> -> vector<4x384xf32>
    %28 = arith.addf %22, %27 : vector<4x384xf32>
    %c5 = arith.constant 5 : index
    %c0_29 = arith.constant 0 : index
    %c0_30 = arith.constant 0 : index
    %29 = vector.load %arg4[%c5, %c0_29, %c0_30] : memref<27x4x8xbf16, #tpu.memory_space<vmem>>, vector<1x4x8xbf16>
    %30 = vector.shape_cast %29 : vector<1x4x8xbf16> to vector<4x8xbf16>
    %c0_31 = arith.constant 0 : index
    %c0_32 = arith.constant 0 : index
    %c0_33 = arith.constant 0 : index
    %c101 = arith.constant 101 : index
    %31 = vector.load %arg3[%c0_31, %c0_32, %c0_33, %c101] : memref<1x1x8x600xbf16, #tpu.memory_space<vmem>>, vector<1x1x8x384xbf16>
    %32 = vector.shape_cast %31 : vector<1x1x8x384xbf16> to vector<8x384xbf16>
    %cst_34 = arith.constant dense<0.000000e+00> : vector<4x384xf32>
    %33 = tpu.matmul %30, %32, %cst_34 {dimension_numbers = #tpu.dot_dimension_numbers<[1], [0], [0], [1], [0, 0, 1, 1], [], []>} : vector<4x8xbf16>, vector<8x384xbf16>, vector<4x384xf32> -> vector<4x384xf32>
    %34 = arith.addf %28, %33 : vector<4x384xf32>
    %c6 = arith.constant 6 : index
    %c0_35 = arith.constant 0 : index
    %c0_36 = arith.constant 0 : index
    %35 = vector.load %arg4[%c6, %c0_35, %c0_36] : memref<27x4x8xbf16, #tpu.memory_space<vmem>>, vector<1x4x8xbf16>
    %36 = vector.shape_cast %35 : vector<1x4x8xbf16> to vector<4x8xbf16>
    %c0_37 = arith.constant 0 : index
    %c0_38 = arith.constant 0 : index
    %c0_39 = arith.constant 0 : index
    %c123 = arith.constant 123 : index
    %37 = vector.load %arg3[%c0_37, %c0_38, %c0_39, %c123] : memref<1x1x8x600xbf16, #tpu.memory_space<vmem>>, vector<1x1x8x384xbf16>
    %38 = vector.shape_cast %37 : vector<1x1x8x384xbf16> to vector<8x384xbf16>
    %cst_40 = arith.constant dense<0.000000e+00> : vector<4x384xf32>
    %39 = tpu.matmul %36, %38, %cst_40 {dimension_numbers = #tpu.dot_dimension_numbers<[1], [0], [0], [1], [0, 0, 1, 1], [], []>} : vector<4x8xbf16>, vector<8x384xbf16>, vector<4x384xf32> -> vector<4x384xf32>
    %40 = arith.addf %34, %39 : vector<4x384xf32>
    %c7 = arith.constant 7 : index
    %c0_41 = arith.constant 0 : index
    %c0_42 = arith.constant 0 : index
    %41 = vector.load %arg4[%c7, %c0_41, %c0_42] : memref<27x4x8xbf16, #tpu.memory_space<vmem>>, vector<1x4x8xbf16>
    %42 = vector.shape_cast %41 : vector<1x4x8xbf16> to vector<4x8xbf16>
    %c0_43 = arith.constant 0 : index
    %c0_44 = arith.constant 0 : index
    %c0_45 = arith.constant 0 : index
    %c124 = arith.constant 124 : index
    %43 = vector.load %arg3[%c0_43, %c0_44, %c0_45, %c124] : memref<1x1x8x600xbf16, #tpu.memory_space<vmem>>, vector<1x1x8x384xbf16>
    %44 = vector.shape_cast %43 : vector<1x1x8x384xbf16> to vector<8x384xbf16>
    %cst_46 = arith.constant dense<0.000000e+00> : vector<4x384xf32>
    %45 = tpu.matmul %42, %44, %cst_46 {dimension_numbers = #tpu.dot_dimension_numbers<[1], [0], [0], [1], [0, 0, 1, 1], [], []>} : vector<4x8xbf16>, vector<8x384xbf16>, vector<4x384xf32> -> vector<4x384xf32>
    %46 = arith.addf %40, %45 : vector<4x384xf32>
    %c8 = arith.constant 8 : index
    %c0_47 = arith.constant 0 : index
    %c0_48 = arith.constant 0 : index
    %47 = vector.load %arg4[%c8, %c0_47, %c0_48] : memref<27x4x8xbf16, #tpu.memory_space<vmem>>, vector<1x4x8xbf16>
    %48 = vector.shape_cast %47 : vector<1x4x8xbf16> to vector<4x8xbf16>
    %c0_49 = arith.constant 0 : index
    %c0_50 = arith.constant 0 : index
    %c0_51 = arith.constant 0 : index
    %c125 = arith.constant 125 : index
    %49 = vector.load %arg3[%c0_49, %c0_50, %c0_51, %c125] : memref<1x1x8x600xbf16, #tpu.memory_space<vmem>>, vector<1x1x8x384xbf16>
    %50 = vector.shape_cast %49 : vector<1x1x8x384xbf16> to vector<8x384xbf16>
    %cst_52 = arith.constant dense<0.000000e+00> : vector<4x384xf32>
    %51 = tpu.matmul %48, %50, %cst_52 {dimension_numbers = #tpu.dot_dimension_numbers<[1], [0], [0], [1], [0, 0, 1, 1], [], []>} : vector<4x8xbf16>, vector<8x384xbf16>, vector<4x384xf32> -> vector<4x384xf32>
    %52 = arith.addf %46, %51 : vector<4x384xf32>
    %c9 = arith.constant 9 : index
    %c0_53 = arith.constant 0 : index
    %c0_54 = arith.constant 0 : index
    %53 = vector.load %arg4[%c9, %c0_53, %c0_54] : memref<27x4x8xbf16, #tpu.memory_space<vmem>>, vector<1x4x8xbf16>
    %54 = vector.shape_cast %53 : vector<1x4x8xbf16> to vector<4x8xbf16>
    %c0_55 = arith.constant 0 : index
    %c0_56 = arith.constant 0 : index
    %c0_57 = arith.constant 0 : index
    %c50 = arith.constant 50 : index
    %55 = vector.load %arg3[%c0_55, %c0_56, %c0_57, %c50] : memref<1x1x8x600xbf16, #tpu.memory_space<vmem>>, vector<1x1x8x384xbf16>
    %56 = vector.shape_cast %55 : vector<1x1x8x384xbf16> to vector<8x384xbf16>
    %cst_58 = arith.constant dense<0.000000e+00> : vector<4x384xf32>
    %57 = tpu.matmul %54, %56, %cst_58 {dimension_numbers = #tpu.dot_dimension_numbers<[1], [0], [0], [1], [0, 0, 1, 1], [], []>} : vector<4x8xbf16>, vector<8x384xbf16>, vector<4x384xf32> -> vector<4x384xf32>
    %58 = arith.addf %52, %57 : vector<4x384xf32>
    %c10 = arith.constant 10 : index
    %c0_59 = arith.constant 0 : index
    %c0_60 = arith.constant 0 : index
    %59 = vector.load %arg4[%c10, %c0_59, %c0_60] : memref<27x4x8xbf16, #tpu.memory_space<vmem>>, vector<1x4x8xbf16>
    %60 = vector.shape_cast %59 : vector<1x4x8xbf16> to vector<4x8xbf16>
    %c0_61 = arith.constant 0 : index
    %c0_62 = arith.constant 0 : index
    %c0_63 = arith.constant 0 : index
    %c52 = arith.constant 52 : index
    %61 = vector.load %arg3[%c0_61, %c0_62, %c0_63, %c52] : memref<1x1x8x600xbf16, #tpu.memory_space<vmem>>, vector<1x1x8x384xbf16>
    %62 = vector.shape_cast %61 : vector<1x1x8x384xbf16> to vector<8x384xbf16>
    %cst_64 = arith.constant dense<0.000000e+00> : vector<4x384xf32>
    %63 = tpu.matmul %60, %62, %cst_64 {dimension_numbers = #tpu.dot_dimension_numbers<[1], [0], [0], [1], [0, 0, 1, 1], [], []>} : vector<4x8xbf16>, vector<8x384xbf16>, vector<4x384xf32> -> vector<4x384xf32>
    %64 = arith.addf %58, %63 : vector<4x384xf32>
    %c11 = arith.constant 11 : index
    %c0_65 = arith.constant 0 : index
    %c0_66 = arith.constant 0 : index
    %65 = vector.load %arg4[%c11, %c0_65, %c0_66] : memref<27x4x8xbf16, #tpu.memory_space<vmem>>, vector<1x4x8xbf16>
    %66 = vector.shape_cast %65 : vector<1x4x8xbf16> to vector<4x8xbf16>
    %c0_67 = arith.constant 0 : index
    %c0_68 = arith.constant 0 : index
    %c0_69 = arith.constant 0 : index
    %c54 = arith.constant 54 : index
    %67 = vector.load %arg3[%c0_67, %c0_68, %c0_69, %c54] : memref<1x1x8x600xbf16, #tpu.memory_space<vmem>>, vector<1x1x8x384xbf16>
    %68 = vector.shape_cast %67 : vector<1x1x8x384xbf16> to vector<8x384xbf16>
    %cst_70 = arith.constant dense<0.000000e+00> : vector<4x384xf32>
    %69 = tpu.matmul %66, %68, %cst_70 {dimension_numbers = #tpu.dot_dimension_numbers<[1], [0], [0], [1], [0, 0, 1, 1], [], []>} : vector<4x8xbf16>, vector<8x384xbf16>, vector<4x384xf32> -> vector<4x384xf32>
    %70 = arith.addf %64, %69 : vector<4x384xf32>
    %c12 = arith.constant 12 : index
    %c0_71 = arith.constant 0 : index
    %c0_72 = arith.constant 0 : index
    %71 = vector.load %arg4[%c12, %c0_71, %c0_72] : memref<27x4x8xbf16, #tpu.memory_space<vmem>>, vector<1x4x8xbf16>
    %72 = vector.shape_cast %71 : vector<1x4x8xbf16> to vector<4x8xbf16>
    %c0_73 = arith.constant 0 : index
    %c0_74 = arith.constant 0 : index
    %c0_75 = arith.constant 0 : index
    %c98 = arith.constant 98 : index
    %73 = vector.load %arg3[%c0_73, %c0_74, %c0_75, %c98] : memref<1x1x8x600xbf16, #tpu.memory_space<vmem>>, vector<1x1x8x384xbf16>
    %74 = vector.shape_cast %73 : vector<1x1x8x384xbf16> to vector<8x384xbf16>
    %cst_76 = arith.constant dense<0.000000e+00> : vector<4x384xf32>
    %75 = tpu.matmul %72, %74, %cst_76 {dimension_numbers = #tpu.dot_dimension_numbers<[1], [0], [0], [1], [0, 0, 1, 1], [], []>} : vector<4x8xbf16>, vector<8x384xbf16>, vector<4x384xf32> -> vector<4x384xf32>
    %76 = arith.addf %70, %75 : vector<4x384xf32>
    %c13 = arith.constant 13 : index
    %c0_77 = arith.constant 0 : index
    %c0_78 = arith.constant 0 : index
    %77 = vector.load %arg4[%c13, %c0_77, %c0_78] : memref<27x4x8xbf16, #tpu.memory_space<vmem>>, vector<1x4x8xbf16>
    %78 = vector.shape_cast %77 : vector<1x4x8xbf16> to vector<4x8xbf16>
    %c0_79 = arith.constant 0 : index
    %c0_80 = arith.constant 0 : index
    %c0_81 = arith.constant 0 : index
    %c100_82 = arith.constant 100 : index
    %79 = vector.load %arg3[%c0_79, %c0_80, %c0_81, %c100_82] : memref<1x1x8x600xbf16, #tpu.memory_space<vmem>>, vector<1x1x8x384xbf16>
    %80 = vector.shape_cast %79 : vector<1x1x8x384xbf16> to vector<8x384xbf16>
    %cst_83 = arith.constant dense<0.000000e+00> : vector<4x384xf32>
    %81 = tpu.matmul %78, %80, %cst_83 {dimension_numbers = #tpu.dot_dimension_numbers<[1], [0], [0], [1], [0, 0, 1, 1], [], []>} : vector<4x8xbf16>, vector<8x384xbf16>, vector<4x384xf32> -> vector<4x384xf32>
    %82 = arith.addf %76, %81 : vector<4x384xf32>
    %c14 = arith.constant 14 : index
    %c0_84 = arith.constant 0 : index
    %c0_85 = arith.constant 0 : index
    %83 = vector.load %arg4[%c14, %c0_84, %c0_85] : memref<27x4x8xbf16, #tpu.memory_space<vmem>>, vector<1x4x8xbf16>
    %84 = vector.shape_cast %83 : vector<1x4x8xbf16> to vector<4x8xbf16>
    %c0_86 = arith.constant 0 : index
    %c0_87 = arith.constant 0 : index
    %c0_88 = arith.constant 0 : index
    %c102 = arith.constant 102 : index
    %85 = vector.load %arg3[%c0_86, %c0_87, %c0_88, %c102] : memref<1x1x8x600xbf16, #tpu.memory_space<vmem>>, vector<1x1x8x384xbf16>
    %86 = vector.shape_cast %85 : vector<1x1x8x384xbf16> to vector<8x384xbf16>
    %cst_89 = arith.constant dense<0.000000e+00> : vector<4x384xf32>
    %87 = tpu.matmul %84, %86, %cst_89 {dimension_numbers = #tpu.dot_dimension_numbers<[1], [0], [0], [1], [0, 0, 1, 1], [], []>} : vector<4x8xbf16>, vector<8x384xbf16>, vector<4x384xf32> -> vector<4x384xf32>
    %88 = arith.addf %82, %87 : vector<4x384xf32>
    %c15 = arith.constant 15 : index
    %c0_90 = arith.constant 0 : index
    %c0_91 = arith.constant 0 : index
    %89 = vector.load %arg4[%c15, %c0_90, %c0_91] : memref<27x4x8xbf16, #tpu.memory_space<vmem>>, vector<1x4x8xbf16>
    %90 = vector.shape_cast %89 : vector<1x4x8xbf16> to vector<4x8xbf16>
    %c0_92 = arith.constant 0 : index
    %c0_93 = arith.constant 0 : index
    %c0_94 = arith.constant 0 : index
    %c146 = arith.constant 146 : index
    %91 = vector.load %arg3[%c0_92, %c0_93, %c0_94, %c146] : memref<1x1x8x600xbf16, #tpu.memory_space<vmem>>, vector<1x1x8x384xbf16>
    %92 = vector.shape_cast %91 : vector<1x1x8x384xbf16> to vector<8x384xbf16>
    %cst_95 = arith.constant dense<0.000000e+00> : vector<4x384xf32>
    %93 = tpu.matmul %90, %92, %cst_95 {dimension_numbers = #tpu.dot_dimension_numbers<[1], [0], [0], [1], [0, 0, 1, 1], [], []>} : vector<4x8xbf16>, vector<8x384xbf16>, vector<4x384xf32> -> vector<4x384xf32>
    %94 = arith.addf %88, %93 : vector<4x384xf32>
    %c16 = arith.constant 16 : index
    %c0_96 = arith.constant 0 : index
    %c0_97 = arith.constant 0 : index
    %95 = vector.load %arg4[%c16, %c0_96, %c0_97] : memref<27x4x8xbf16, #tpu.memory_space<vmem>>, vector<1x4x8xbf16>
    %96 = vector.shape_cast %95 : vector<1x4x8xbf16> to vector<4x8xbf16>
    %c0_98 = arith.constant 0 : index
    %c0_99 = arith.constant 0 : index
    %c0_100 = arith.constant 0 : index
    %c148 = arith.constant 148 : index
    %97 = vector.load %arg3[%c0_98, %c0_99, %c0_100, %c148] : memref<1x1x8x600xbf16, #tpu.memory_space<vmem>>, vector<1x1x8x384xbf16>
    %98 = vector.shape_cast %97 : vector<1x1x8x384xbf16> to vector<8x384xbf16>
    %cst_101 = arith.constant dense<0.000000e+00> : vector<4x384xf32>
    %99 = tpu.matmul %96, %98, %cst_101 {dimension_numbers = #tpu.dot_dimension_numbers<[1], [0], [0], [1], [0, 0, 1, 1], [], []>} : vector<4x8xbf16>, vector<8x384xbf16>, vector<4x384xf32> -> vector<4x384xf32>
    %100 = arith.addf %94, %99 : vector<4x384xf32>
    %c17 = arith.constant 17 : index
    %c0_102 = arith.constant 0 : index
    %c0_103 = arith.constant 0 : index
    %101 = vector.load %arg4[%c17, %c0_102, %c0_103] : memref<27x4x8xbf16, #tpu.memory_space<vmem>>, vector<1x4x8xbf16>
    %102 = vector.shape_cast %101 : vector<1x4x8xbf16> to vector<4x8xbf16>
    %c0_104 = arith.constant 0 : index
    %c0_105 = arith.constant 0 : index
    %c0_106 = arith.constant 0 : index
    %c150 = arith.constant 150 : index
    %103 = vector.load %arg3[%c0_104, %c0_105, %c0_106, %c150] : memref<1x1x8x600xbf16, #tpu.memory_space<vmem>>, vector<1x1x8x384xbf16>
    %104 = vector.shape_cast %103 : vector<1x1x8x384xbf16> to vector<8x384xbf16>
    %cst_107 = arith.constant dense<0.000000e+00> : vector<4x384xf32>
    %105 = tpu.matmul %102, %104, %cst_107 {dimension_numbers = #tpu.dot_dimension_numbers<[1], [0], [0], [1], [0, 0, 1, 1], [], []>} : vector<4x8xbf16>, vector<8x384xbf16>, vector<4x384xf32> -> vector<4x384xf32>
    %106 = arith.addf %100, %105 : vector<4x384xf32>
    %c18 = arith.constant 18 : index
    %c0_108 = arith.constant 0 : index
    %c0_109 = arith.constant 0 : index
    %107 = vector.load %arg4[%c18, %c0_108, %c0_109] : memref<27x4x8xbf16, #tpu.memory_space<vmem>>, vector<1x4x8xbf16>
    %108 = vector.shape_cast %107 : vector<1x4x8xbf16> to vector<4x8xbf16>
    %c0_110 = arith.constant 0 : index
    %c0_111 = arith.constant 0 : index
    %c0_112 = arith.constant 0 : index
    %c0_113 = arith.constant 0 : index
    %109 = vector.load %arg3[%c0_110, %c0_111, %c0_112, %c0_113] : memref<1x1x8x600xbf16, #tpu.memory_space<vmem>>, vector<1x1x8x384xbf16>
    %110 = vector.shape_cast %109 : vector<1x1x8x384xbf16> to vector<8x384xbf16>
    %cst_114 = arith.constant dense<0.000000e+00> : vector<4x384xf32>
    %111 = tpu.matmul %108, %110, %cst_114 {dimension_numbers = #tpu.dot_dimension_numbers<[1], [0], [0], [1], [0, 0, 1, 1], [], []>} : vector<4x8xbf16>, vector<8x384xbf16>, vector<4x384xf32> -> vector<4x384xf32>
    %112 = arith.addf %106, %111 : vector<4x384xf32>
    %c19 = arith.constant 19 : index
    %c0_115 = arith.constant 0 : index
    %c0_116 = arith.constant 0 : index
    %113 = vector.load %arg4[%c19, %c0_115, %c0_116] : memref<27x4x8xbf16, #tpu.memory_space<vmem>>, vector<1x4x8xbf16>
    %114 = vector.shape_cast %113 : vector<1x4x8xbf16> to vector<4x8xbf16>
    %c0_117 = arith.constant 0 : index
    %c0_118 = arith.constant 0 : index
    %c0_119 = arith.constant 0 : index
    %c4_120 = arith.constant 4 : index
    %115 = vector.load %arg3[%c0_117, %c0_118, %c0_119, %c4_120] : memref<1x1x8x600xbf16, #tpu.memory_space<vmem>>, vector<1x1x8x384xbf16>
    %116 = vector.shape_cast %115 : vector<1x1x8x384xbf16> to vector<8x384xbf16>
    %cst_121 = arith.constant dense<0.000000e+00> : vector<4x384xf32>
    %117 = tpu.matmul %114, %116, %cst_121 {dimension_numbers = #tpu.dot_dimension_numbers<[1], [0], [0], [1], [0, 0, 1, 1], [], []>} : vector<4x8xbf16>, vector<8x384xbf16>, vector<4x384xf32> -> vector<4x384xf32>
    %118 = arith.addf %112, %117 : vector<4x384xf32>
    %c20 = arith.constant 20 : index
    %c0_122 = arith.constant 0 : index
    %c0_123 = arith.constant 0 : index
    %119 = vector.load %arg4[%c20, %c0_122, %c0_123] : memref<27x4x8xbf16, #tpu.memory_space<vmem>>, vector<1x4x8xbf16>
    %120 = vector.shape_cast %119 : vector<1x4x8xbf16> to vector<4x8xbf16>
    %c0_124 = arith.constant 0 : index
    %c0_125 = arith.constant 0 : index
    %c0_126 = arith.constant 0 : index
    %c8_127 = arith.constant 8 : index
    %121 = vector.load %arg3[%c0_124, %c0_125, %c0_126, %c8_127] : memref<1x1x8x600xbf16, #tpu.memory_space<vmem>>, vector<1x1x8x384xbf16>
    %122 = vector.shape_cast %121 : vector<1x1x8x384xbf16> to vector<8x384xbf16>
    %cst_128 = arith.constant dense<0.000000e+00> : vector<4x384xf32>
    %123 = tpu.matmul %120, %122, %cst_128 {dimension_numbers = #tpu.dot_dimension_numbers<[1], [0], [0], [1], [0, 0, 1, 1], [], []>} : vector<4x8xbf16>, vector<8x384xbf16>, vector<4x384xf32> -> vector<4x384xf32>
    %124 = arith.addf %118, %123 : vector<4x384xf32>
    %c21 = arith.constant 21 : index
    %c0_129 = arith.constant 0 : index
    %c0_130 = arith.constant 0 : index
    %125 = vector.load %arg4[%c21, %c0_129, %c0_130] : memref<27x4x8xbf16, #tpu.memory_space<vmem>>, vector<1x4x8xbf16>
    %126 = vector.shape_cast %125 : vector<1x4x8xbf16> to vector<4x8xbf16>
    %c0_131 = arith.constant 0 : index
    %c0_132 = arith.constant 0 : index
    %c0_133 = arith.constant 0 : index
    %c96 = arith.constant 96 : index
    %127 = vector.load %arg3[%c0_131, %c0_132, %c0_133, %c96] : memref<1x1x8x600xbf16, #tpu.memory_space<vmem>>, vector<1x1x8x384xbf16>
    %128 = vector.shape_cast %127 : vector<1x1x8x384xbf16> to vector<8x384xbf16>
    %cst_134 = arith.constant dense<0.000000e+00> : vector<4x384xf32>
    %129 = tpu.matmul %126, %128, %cst_134 {dimension_numbers = #tpu.dot_dimension_numbers<[1], [0], [0], [1], [0, 0, 1, 1], [], []>} : vector<4x8xbf16>, vector<8x384xbf16>, vector<4x384xf32> -> vector<4x384xf32>
    %130 = arith.addf %124, %129 : vector<4x384xf32>
    %c22 = arith.constant 22 : index
    %c0_135 = arith.constant 0 : index
    %c0_136 = arith.constant 0 : index
    %131 = vector.load %arg4[%c22, %c0_135, %c0_136] : memref<27x4x8xbf16, #tpu.memory_space<vmem>>, vector<1x4x8xbf16>
    %132 = vector.shape_cast %131 : vector<1x4x8xbf16> to vector<4x8xbf16>
    %c0_137 = arith.constant 0 : index
    %c0_138 = arith.constant 0 : index
    %c0_139 = arith.constant 0 : index
    %c100_140 = arith.constant 100 : index
    %133 = vector.load %arg3[%c0_137, %c0_138, %c0_139, %c100_140] : memref<1x1x8x600xbf16, #tpu.memory_space<vmem>>, vector<1x1x8x384xbf16>
    %134 = vector.shape_cast %133 : vector<1x1x8x384xbf16> to vector<8x384xbf16>
    %cst_141 = arith.constant dense<0.000000e+00> : vector<4x384xf32>
    %135 = tpu.matmul %132, %134, %cst_141 {dimension_numbers = #tpu.dot_dimension_numbers<[1], [0], [0], [1], [0, 0, 1, 1], [], []>} : vector<4x8xbf16>, vector<8x384xbf16>, vector<4x384xf32> -> vector<4x384xf32>
    %136 = arith.addf %130, %135 : vector<4x384xf32>
    %c23 = arith.constant 23 : index
    %c0_142 = arith.constant 0 : index
    %c0_143 = arith.constant 0 : index
    %137 = vector.load %arg4[%c23, %c0_142, %c0_143] : memref<27x4x8xbf16, #tpu.memory_space<vmem>>, vector<1x4x8xbf16>
    %138 = vector.shape_cast %137 : vector<1x4x8xbf16> to vector<4x8xbf16>
    %c0_144 = arith.constant 0 : index
    %c0_145 = arith.constant 0 : index
    %c0_146 = arith.constant 0 : index
    %c104 = arith.constant 104 : index
    %139 = vector.load %arg3[%c0_144, %c0_145, %c0_146, %c104] : memref<1x1x8x600xbf16, #tpu.memory_space<vmem>>, vector<1x1x8x384xbf16>
    %140 = vector.shape_cast %139 : vector<1x1x8x384xbf16> to vector<8x384xbf16>
    %cst_147 = arith.constant dense<0.000000e+00> : vector<4x384xf32>
    %141 = tpu.matmul %138, %140, %cst_147 {dimension_numbers = #tpu.dot_dimension_numbers<[1], [0], [0], [1], [0, 0, 1, 1], [], []>} : vector<4x8xbf16>, vector<8x384xbf16>, vector<4x384xf32> -> vector<4x384xf32>
    %142 = arith.addf %136, %141 : vector<4x384xf32>
    %c24 = arith.constant 24 : index
    %c0_148 = arith.constant 0 : index
    %c0_149 = arith.constant 0 : index
    %143 = vector.load %arg4[%c24, %c0_148, %c0_149] : memref<27x4x8xbf16, #tpu.memory_space<vmem>>, vector<1x4x8xbf16>
    %144 = vector.shape_cast %143 : vector<1x4x8xbf16> to vector<4x8xbf16>
    %c0_150 = arith.constant 0 : index
    %c0_151 = arith.constant 0 : index
    %c0_152 = arith.constant 0 : index
    %c192 = arith.constant 192 : index
    %145 = vector.load %arg3[%c0_150, %c0_151, %c0_152, %c192] : memref<1x1x8x600xbf16, #tpu.memory_space<vmem>>, vector<1x1x8x384xbf16>
    %146 = vector.shape_cast %145 : vector<1x1x8x384xbf16> to vector<8x384xbf16>
    %cst_153 = arith.constant dense<0.000000e+00> : vector<4x384xf32>
    %147 = tpu.matmul %144, %146, %cst_153 {dimension_numbers = #tpu.dot_dimension_numbers<[1], [0], [0], [1], [0, 0, 1, 1], [], []>} : vector<4x8xbf16>, vector<8x384xbf16>, vector<4x384xf32> -> vector<4x384xf32>
    %148 = arith.addf %142, %147 : vector<4x384xf32>
    %c25 = arith.constant 25 : index
    %c0_154 = arith.constant 0 : index
    %c0_155 = arith.constant 0 : index
    %149 = vector.load %arg4[%c25, %c0_154, %c0_155] : memref<27x4x8xbf16, #tpu.memory_space<vmem>>, vector<1x4x8xbf16>
    %150 = vector.shape_cast %149 : vector<1x4x8xbf16> to vector<4x8xbf16>
    %c0_156 = arith.constant 0 : index
    %c0_157 = arith.constant 0 : index
    %c0_158 = arith.constant 0 : index
    %c196 = arith.constant 196 : index
    %151 = vector.load %arg3[%c0_156, %c0_157, %c0_158, %c196] : memref<1x1x8x600xbf16, #tpu.memory_space<vmem>>, vector<1x1x8x384xbf16>
    %152 = vector.shape_cast %151 : vector<1x1x8x384xbf16> to vector<8x384xbf16>
    %cst_159 = arith.constant dense<0.000000e+00> : vector<4x384xf32>
    %153 = tpu.matmul %150, %152, %cst_159 {dimension_numbers = #tpu.dot_dimension_numbers<[1], [0], [0], [1], [0, 0, 1, 1], [], []>} : vector<4x8xbf16>, vector<8x384xbf16>, vector<4x384xf32> -> vector<4x384xf32>
    %154 = arith.addf %148, %153 : vector<4x384xf32>
    %c26 = arith.constant 26 : index
    %c0_160 = arith.constant 0 : index
    %c0_161 = arith.constant 0 : index
    %155 = vector.load %arg4[%c26, %c0_160, %c0_161] : memref<27x4x8xbf16, #tpu.memory_space<vmem>>, vector<1x4x8xbf16>
    %156 = vector.shape_cast %155 : vector<1x4x8xbf16> to vector<4x8xbf16>
    %c0_162 = arith.constant 0 : index
    %c0_163 = arith.constant 0 : index
    %c0_164 = arith.constant 0 : index
    %c200 = arith.constant 200 : index
    %157 = vector.load %arg3[%c0_162, %c0_163, %c0_164, %c200] : memref<1x1x8x600xbf16, #tpu.memory_space<vmem>>, vector<1x1x8x384xbf16>
    %158 = vector.shape_cast %157 : vector<1x1x8x384xbf16> to vector<8x384xbf16>
    %cst_165 = arith.constant dense<0.000000e+00> : vector<4x384xf32>
    %159 = tpu.matmul %156, %158, %cst_165 {dimension_numbers = #tpu.dot_dimension_numbers<[1], [0], [0], [1], [0, 0, 1, 1], [], []>} : vector<4x8xbf16>, vector<8x384xbf16>, vector<4x384xf32> -> vector<4x384xf32>
    %160 = arith.addf %154, %159 : vector<4x384xf32>
    %c0_i32 = arith.constant 0 : i32
    %161 = arith.cmpi eq, %arg2, %c0_i32 : i32
    %162 = arith.extui %161 : i1 to i32
    %c0_i32_166 = arith.constant 0 : i32
    %163 = arith.cmpi ne, %162, %c0_i32_166 : i32
    scf.if %163 {
      %c0_169 = arith.constant 0 : index
      %c0_170 = arith.constant 0 : index
      %167 = vector.load %arg5[%c0_169, %c0_170] : memref<4x1xf32, #tpu.memory_space<vmem>>, vector<4x1xf32>
      %168 = vector.broadcast %167 : vector<4x1xf32> to vector<4x384xf32>
      %169 = arith.addf %160, %168 : vector<4x384xf32>
      %c0_171 = arith.constant 0 : index
      %c0_172 = arith.constant 0 : index
      %c0_173 = arith.constant 0 : index
      %170 = vector.load %arg6[%c0_171, %c0_172, %c0_173] : memref<1x4x384xf32, #tpu.memory_space<vmem>>, vector<1x4x384xf32>
      %171 = vector.shape_cast %170 : vector<1x4x384xf32> to vector<4x384xf32>
      %172 = vector.shape_cast %169 : vector<4x384xf32> to vector<1x4x384xf32>
      tpu.vector_store %arg6[%c0_171, %c0_172, %c0_173], %172 {strides = array<i32>} : memref<1x4x384xf32, #tpu.memory_space<vmem>>, vector<1x4x384xf32>,
    } else {
    }
    %c0_i32_167 = arith.constant 0 : i32
    %164 = arith.cmpi sgt, %arg2, %c0_i32_167 : i32
    %165 = arith.extui %164 : i1 to i32
    %c0_i32_168 = arith.constant 0 : i32
    %166 = arith.cmpi ne, %165, %c0_i32_168 : i32
    scf.if %166 {
      %c0_169 = arith.constant 0 : index
      %c0_170 = arith.constant 0 : index
      %c0_171 = arith.constant 0 : index
      %167 = vector.load %arg6[%c0_169, %c0_170, %c0_171] : memref<1x4x384xf32, #tpu.memory_space<vmem>>, vector<1x4x384xf32>
      %168 = vector.shape_cast %167 : vector<1x4x384xf32> to vector<4x384xf32>
      %169 = arith.addf %168, %160 : vector<4x384xf32>
      %c0_172 = arith.constant 0 : index
      %c0_173 = arith.constant 0 : index
      %c0_174 = arith.constant 0 : index
      %170 = vector.load %arg6[%c0_172, %c0_173, %c0_174] : memref<1x4x384xf32, #tpu.memory_space<vmem>>, vector<1x4x384xf32>
      %171 = vector.shape_cast %170 : vector<1x4x384xf32> to vector<4x384xf32>
      %172 = vector.shape_cast %169 : vector<4x384xf32> to vector<1x4x384xf32>
      tpu.vector_store %arg6[%c0_172, %c0_173, %c0_174], %172 {strides = array<i32>} : memref<1x4x384xf32, #tpu.memory_space<vmem>>, vector<1x4x384xf32>,
    } else {
    }
    return
  }
  func.func @transform_0(%arg0: i32, %arg1: i32, %arg2: i32) -> (i32, i32, i32, i32) {
    %c0_i32 = arith.constant 0 : i32
    %c0_i32_0 = arith.constant 0 : i32
    return %arg0, %arg1, %arg2, %c0_i32 : i32, i32, i32, i32
  }
  func.func @transform_1(%arg0: i32, %arg1: i32, %arg2: i32) -> (i32, i32, i32) {
    %c0_i32 = arith.constant 0 : i32
    %c0_i32_0 = arith.constant 0 : i32
    %c0_i32_1 = arith.constant 0 : i32
    return %c0_i32, %c0_i32_0, %arg2 : i32, i32, i32
  }
  func.func @transform_2(%arg0: i32, %arg1: i32, %arg2: i32) -> (i32, i32) {
    %c0_i32 = arith.constant 0 : i32
    %c0_i32_0 = arith.constant 0 : i32
    %c0_i32_1 = arith.constant 0 : i32
    return %c0_i32, %c0_i32_0 : i32, i32
  }
  func.func @transform_3(%arg0: i32, %arg1: i32, %arg2: i32) -> (i32, i32, i32) {
    %c0_i32 = arith.constant 0 : i32
    %c0_i32_0 = arith.constant 0 : i32
    return %arg0, %c0_i32, %arg1 : i32, i32, i32
  }
}

</mosaic_0001>

<bundles_post_ra>
// kernel: tpu_custom_call.1
= control target key start
LH: loop header
LB: loop body
LE: loop exit
PB: predicated region body
PF: predicated region fallthrough
CT: control target
= control target key end

     0   :  { %8 = vsyncpa [#allocation3], 0  ;;  %s4484_s0 = inlined_call_operand.vmem [shape: bf16[2,1,8,600], index: 0, kind: input, shape index: {}]   ;;  %s4485_s1 = inlined_call_operand.vmem [shape: bf16[27,4,8], index: 1, kind: input, shape index: {}]   ;;  %s4486_s2 = inlined_call_operand.vmem [shape: f32[4,1], index: 2, kind: input, shape index: {}]   ;;  %s4487_s3 = inlined_call_operand.hbm [shape: f32[2,4,384], index: 3, kind: output, shape index: {}]  }
   0x1   :  { %10 = vsyncpa [#allocation3 + $0x1], 0  ;;  %s3900_s12 = smov 0   ;;  %s3902_s13 = smov 0  }
   0x2   :  { %s3904_s14 = smov 0   ;;  %s3906_s15 = smov 0  }
   0x3   :  { %s3908_s16 = smov 0   ;;  %s3910_s17 = smov 0  }
   0x4 LB: > { %s3335_s18 = sadd.s32 4294967295, %s3850_s17   ;;  %s3336_s19 = sadd.s32 4294967294, %s3850_s17   ;;  %s3850_s17 = sphi %s3910_s17, %s16_s17   ;;  %s3846_s16 = sphi %s3908_s16, %s4494_s16   ;;  %s3842_s15 = sphi %s3906_s15, %s4493_s15   ;;  %s3838_s14 = sphi %s3904_s14, %s4492_s14   ;;  %s3834_s13 = sphi %s3902_s13, %s4491_s13   ;;  %s3830_s12 = sphi %s3900_s12, %s4490_s12  }
   0x5   : > { %s35_s20 = sadd.s32 1, %s3846_s16  ;;  %s121_s21 = sadd.s32 1, %s3838_s14 }
   0x6   : > { %p37_p0 = scmp.ge.s32.totalorder %s35_s20, 2  ;;  %p131_p1 = scmp.ne.s32.totalorder %s3838_s14, %s3834_s13 }
   0x7   : > { %p132_p2 = scmp.eq.s32.totalorder %s3335_s18, 1  ;;  %p137_p3 = scmp.ne.s32.totalorder %s3834_s13, %s3830_s12 }
   0x8   : > { %s4496_s20 = smov (%p37_p0, %s35_s20), 0  ;;  %p138_p5 = scmp.eq.s32.totalorder %s3336_s19, 1 }
   0x9   : > { %p3940_p4 = por %p132_p2, %p131_p1  ;;  %s116_s23 = ssub.s32 %s3846_s16, %s4496_s20 }
   0xa   : > { %p3340_p6 = scmp.ge.s32.totalorder %s3850_s17, 1  ;;  %p119_p7 = scmp.eq.s32.totalorder %s116_s23, 0 }
   0xb   : > { %p3947_p8 = por %p138_p5, %p137_p3  ;;  %p182_p9 = scmp.lt.s32.totalorder %s3850_s17, 3 }
   0xc   : > { %s3953_s25 = scalar_select %p119_p7, %s3838_s14, %s121_s21  }
   0xd   : > { %p183_p10 = pnand %p3340_p6, %p182_p9 }
   0xe   : > { %p218_p11 = scmp.lt.s32.totalorder (!%p183_p10), %s3842_s15, 1  ;;  %s3855_s4 = smov (!%p183_p10), 52  }
   0xf   : > { %186 = sbr.rel (%p183_p10) target bundleno = 574 (0x23e), region = 32  ;;  %s3856_s5 = smov (!%p183_p10), 53  }
  0x10   : > { %s3857_s6 = smov (!%p183_p10), 51   ;;  %s3858_s7 = smov (!%p183_p10), 29  }
  0x11   : > { %s3859_s8 = smov (!%p183_p10), 28   ;;  %s3860_s9 = smov (!%p183_p10), 27  }
  0x12   : > { %s3861_s10 = smov (!%p183_p10), 5   ;;  %s3862_s11 = smov (!%p183_p10), 4  }
  0x13   : > { %s3863_s18 = smov (!%p183_p10), 3   ;;  %s3864_s19 = smov (!%p183_p10), 78  }
  0x14   : > { %v3852_v0 = vmov 0.0   ;;  %s219_s26 = scalar_select %p218_p11, %s3842_s15, 1  ;;  %v3853_v1 = vmov 0   ;;  %vm3854_vm0 = vmmov 0   ;;  %vm260_vm1 = vcmask 424960  }
  0x15   : > { %3517 = vmatprep.subr.bf16.mxu1 %v3852_v0  ;;  %310 = vmatprep.mubr.bf16.mxu0 %v3853_v1  ;;  %s3865_s21 = smov 76   ;;  %s3866_s23 = smov 74   ;;  %vm268_vm2 = vcmask 1043456   ;;  %v3342_v23 = vld [vmem:[%s4485_s1 + $0x2] sm:$0x3]  ;;  %vm264_vm3 = vcmask 64512  }
  0x16   : > { %s3680_s27 = smul.u32 20, %s219_s26  ;;  %3519 = vmatprep.mubr.msk.bf16.mxu1 %vm3854_vm0, %v3852_v0  ;;  %3764 = vset.pattern.permute.xlu0 %v3853_v1  ;;  %s3867_s26 = smov 30   ;;  %vm367_vm4 = vcmask 433152   ;;  %v237_v33 = vld [vmem:[%s4485_s1] sm:$0x3]  ;;  %vm474_vm5 = vcmask 416768  }
  0x17   : > { %s3869_s28 = smov 110   ;;  %s3870_s29 = smov 108   ;;  %v3353_v43 = vld [vmem:[%s4485_s1 + $0x4] sm:$0x3]  ;;  %vm584_vm6 = vcmask 236544   ;;  %vm694_vm7 = vcmask 228352  }
  0x18   : > { %s3964_s30 = scalar_lea.vmem %s4484_s0, %s3680_s27  ;;  %s3868_s27 = smov 26   ;;  %v3357_v53 = vld [vmem:[%s4485_s1 + $0x6] sm:$0x3]  ;;  %v3361_v63 = vld [vmem:[%s4485_s1 + $0x8] sm:$0x3]  ;;  %vm804_vm8 = vcmask 220160  }
  0x19   : > { %v239_v2 = vld [vmem:[%s3964_s30 + $0x8] sm:$0xff]  ;;  %v238_v3 = vld [vmem:[%s3964_s30] sm:$0xff]  ;;  %vm914_vm9 = vcmask 39936   ;;  %vm1024_vm10 = vcmask 31744   ;;  %vm1134_vm11 = vcmask 23552   ;;  %vm1244_vm12 = vcmask 637952  }
  0x1a   : > { %v3969_v4 = vcombine.low %v239_v2, %v239_v2  ;;  %v3971_v5 = vcombine.low %v238_v3, %v238_v3  ;;  %v3975_v6 = vcombine.high %v239_v2, %v239_v2  ;;  %v3977_v7 = vcombine.high %v238_v3, %v238_v3  ;;  %v1875_v8 = vld [vmem:[%s3964_s30 + $0x4] sm:$0xff]  ;;  %v1876_v11 = vld [vmem:[%s3964_s30 + $0xc] sm:$0xff] }
  0x1b   : > { %v4034_v9 = vcombine.low %v1875_v8, %v1875_v8  ;;  %v4036_v10 = vcombine.high %v1875_v8, %v1875_v8  ;;  %v4041_v12 = vcombine.low %v1876_v11, %v1876_v11  ;;  %v4043_v13 = vcombine.high %v1876_v11, %v1876_v11 }
  0x1c   : > { %256 = vrot.lane.b32.xlu1 %v3969_v4, %s3855_s4  ;;  %252 = vrot.lane.b32.xlu0 %v3971_v5, %s3855_s4  ;;  %vm1354_vm13 = vcmask 621568   ;;  %vm1464_vm14 = vcmask 605184   ;;  %vm1574_vm15 = vcmask 244736  }
  0x20   : > { %258 = vrot.lane.b32.xlu1 %v3975_v6, %s3855_s4  ;;  %254 = vrot.lane.b32.xlu0 %v3977_v7, %s3855_s4  ;;  %s3875_s4 = smov 24  }
  0x24   : > { %361 = vrot.lane.b32.xlu1 %v3977_v7, %s3856_s5  ;;  %359 = vrot.lane.b32.xlu0 %v3971_v5, %s3856_s5 }
  0x28   : > { %365 = vrot.lane.b32.xlu1 %v3975_v6, %s3856_s5  ;;  %363 = vrot.lane.b32.xlu0 %v3969_v4, %s3856_s5 }
  0x2c   : > { %468 = vrot.lane.b32.xlu1 %v3977_v7, %s3857_s6  ;;  %466 = vrot.lane.b32.xlu0 %v3971_v5, %s3857_s6 }
  0x30   : > { %472 = vrot.lane.b32.xlu1 %v3975_v6, %s3857_s6  ;;  %470 = vrot.lane.b32.xlu0 %v3969_v4, %s3857_s6 }
  0x34   : > { %578 = vrot.lane.b32.xlu1 %v3977_v7, %s3858_s7  ;;  %576 = vrot.lane.b32.xlu0 %v3971_v5, %s3858_s7 }
  0x38   : > { %582 = vrot.lane.b32.xlu1 %v3975_v6, %s3858_s7  ;;  %580 = vrot.lane.b32.xlu0 %v3969_v4, %s3858_s7  ;;  %s3876_s7 = smov 64  }
  0x3c   : > { %688 = vrot.lane.b32.xlu1 %v3977_v7, %s3859_s8  ;;  %686 = vrot.lane.b32.xlu0 %v3971_v5, %s3859_s8 }
  0x40   : > { %692 = vrot.lane.b32.xlu1 %v3975_v6, %s3859_s8  ;;  %690 = vrot.lane.b32.xlu0 %v3969_v4, %s3859_s8  ;;  %s3871_s8 = smov 106  }
  0x44   : > { %798 = vrot.lane.b32.xlu1 %v3977_v7, %s3860_s9  ;;  %796 = vrot.lane.b32.xlu0 %v3971_v5, %s3860_s9 }
  0x48   : > { %802 = vrot.lane.b32.xlu1 %v3975_v6, %s3860_s9  ;;  %800 = vrot.lane.b32.xlu0 %v3969_v4, %s3860_s9 }
  0x4c   : > { %908 = vrot.lane.b32.xlu1 %v3977_v7, %s3861_s10  ;;  %906 = vrot.lane.b32.xlu0 %v3971_v5, %s3861_s10 }
  0x50   : > { %912 = vrot.lane.b32.xlu1 %v3975_v6, %s3861_s10  ;;  %910 = vrot.lane.b32.xlu0 %v3969_v4, %s3861_s10  ;;  %s3877_s10 = smov 60  }
  0x54   : > { %1018 = vrot.lane.b32.xlu1 %v3977_v7, %s3862_s11  ;;  %1016 = vrot.lane.b32.xlu0 %v3971_v5, %s3862_s11 }
  0x58   : > { %1022 = vrot.lane.b32.xlu1 %v3975_v6, %s3862_s11  ;;  %1020 = vrot.lane.b32.xlu0 %v3969_v4, %s3862_s11  ;;  %s3872_s11 = smov 124  }
  0x5c   : > { %1128 = vrot.lane.b32.xlu1 %v3977_v7, %s3863_s18  ;;  %1126 = vrot.lane.b32.xlu0 %v3971_v5, %s3863_s18 }
  0x60   : > { %1132 = vrot.lane.b32.xlu1 %v3975_v6, %s3863_s18  ;;  %1130 = vrot.lane.b32.xlu0 %v3969_v4, %s3863_s18 }
  0x64   : > { %1238 = vrot.lane.b32.xlu1 %v3977_v7, %s3864_s19  ;;  %1236 = vrot.lane.b32.xlu0 %v3971_v5, %s3864_s19 }
  0x68   : > { %1242 = vrot.lane.b32.xlu1 %v3975_v6, %s3864_s19  ;;  %1240 = vrot.lane.b32.xlu0 %v3969_v4, %s3864_s19  ;;  %s3878_s19 = smov 56  }
  0x6c   : > { %1348 = vrot.lane.b32.xlu1 %v3977_v7, %s3865_s21  ;;  %1346 = vrot.lane.b32.xlu0 %v3971_v5, %s3865_s21 }
  0x70   : > { %1352 = vrot.lane.b32.xlu1 %v3975_v6, %s3865_s21  ;;  %1350 = vrot.lane.b32.xlu0 %v3969_v4, %s3865_s21  ;;  %s3873_s21 = smov 120  }
  0x74   : > { %1458 = vrot.lane.b32.xlu1 %v3977_v7, %s3866_s23  ;;  %1456 = vrot.lane.b32.xlu0 %v3971_v5, %s3866_s23 }
  0x78   : > { %1462 = vrot.lane.b32.xlu1 %v3975_v6, %s3866_s23  ;;  %1460 = vrot.lane.b32.xlu0 %v3969_v4, %s3866_s23 }
  0x7c   : > { %1568 = vrot.lane.b32.xlu1 %v3977_v7, %s3867_s26  ;;  %1566 = vrot.lane.b32.xlu0 %v3971_v5, %s3867_s26 }
  0x80   : > { %1572 = vrot.lane.b32.xlu1 %v3975_v6, %s3867_s26  ;;  %1570 = vrot.lane.b32.xlu0 %v3969_v4, %s3867_s26 }
  0x84   : > { %1765 = vrot.lane.b32.xlu0 %v3971_v5, %s3868_s27  ;;  %1767 = vrot.lane.b32.xlu1 %v3977_v7, %s3868_s27 }
  0x88   : > { %1769 = vrot.lane.b32.xlu0 %v3969_v4, %s3868_s27  ;;  %1771 = vrot.lane.b32.xlu1 %v3975_v6, %s3868_s27  ;;  %s3874_s27 = smov 32  }
  0x8c   : > { %1887 = vrot.lane.b32.xlu0 %v4034_v9, %s3869_s28  ;;  %1889 = vrot.lane.b32.xlu1 %v4036_v10, %s3869_s28 }
  0x8e   : > { %v257_v14 = vpop.permute.xlu1 %256  ;;  %v253_v15 = vpop.permute.xlu0 %252 }
  0x90   : > { %1891 = vrot.lane.b32.xlu0 %v4041_v12, %s3869_s28  ;;  %1893 = vrot.lane.b32.xlu1 %v4043_v13, %s3869_s28  ;;  %s215_s28 = sand.u32 1, %s3834_s13  }
  0x92   : > { %v259_v16 = vpop.permute.xlu1 %258  ;;  %v255_v17 = vpop.permute.xlu0 %254 }
  0x93   : > { %v262_v18 = vsel %vm260_vm1, %v255_v17, %v257_v14  ;;  %v261_v19 = vsel %vm260_vm1, %v253_v15, %v255_v17  ;;  %v263_v20 = vsel %vm260_vm1, %v257_v14, %v259_v16  ;;  %vm1773_vm1 = vcmask 211968  }
  0x94   : > { %3347 = vmatprep.subr.msk.bf16.mxu0 %vm268_vm2, %v262_v18  ;;  %v270_v21 = vsel %vm268_vm2, %v261_v19, 0  ;;  %v276_v22 = vsel %vm268_vm2, %v263_v20, 0  ;;  %1997 = vrot.lane.b32.xlu0 %v4034_v9, %s3870_s29  ;;  %v3365_v19 = vld [vmem:[%s4485_s1 + $0xa] sm:$0x3] }
  0x95   : > { %293 = vmatpush1.bf16.msra.mxu0 %v270_v21  ;;  %3518 = vmatpush3.bf16.msra.mxu1 %v276_v22 }
  0x96   : > { %v362_v24 = vpop.permute.xlu1 %361  ;;  %v360_v25 = vpop.permute.xlu0 %359  ;;  %3523 = vmatprep.subr.bf16.mxu1 %v3852_v0  ;;  %1999 = vrot.lane.b32.xlu1 %v4036_v10, %s3870_s29 }
  0x97   : > { %v368_v26 = vsel %vm367_vm4, %v360_v25, %v362_v24 }
  0x98   : > { %3520 = vmatmul.mubr.msk.bf16.vlgmr.msra.gmra.mxu1 %vm264_vm3, %v3342_v23  ;;  %3348 = vmatmul.mubr.msk.bf16.vlgmr.msra.gmra.mxu0 %vm264_vm3, %v3342_v23  ;;  %v375_v31 = vsel %vm268_vm2, %v368_v26, 0 }
  0x99   : > { %2001 = vrot.lane.b32.xlu0 %v4041_v12, %s3870_s29  ;;  %415 = vmatprep.mubr.bf16.mxu0 %v3853_v1 }
  0x9a   : > { %v366_v27 = vpop.permute.xlu1 %365  ;;  %v364_v28 = vpop.permute.xlu0 %363  ;;  %3525 = vmatprep.mubr.msk.bf16.mxu1 %vm3854_vm0, %v3852_v0  ;;  %2003 = vrot.lane.b32.xlu1 %v4043_v13, %s3870_s29  ;;  %s3679_s29 = smul.u32 12, %s215_s28 }
  0x9b   : > { %v369_v29 = vsel %vm367_vm4, %v362_v24, %v364_v28  ;;  %v370_v30 = vsel %vm367_vm4, %v364_v28, %v366_v27  ;;  %vm1895_vm4 = vcmask 900096  }
  0x9c   : > { %v381_v32 = vsel %vm268_vm2, %v370_v30, 0  ;;  %3350 = vmatprep.subr.msk.bf16.mxu0 %vm268_vm2, %v369_v29  ;;  %v3369_v29 = vld [vmem:[%s4485_s1 + $0xc] sm:$0x3]  ;;  %s217_s5 = scalar_lea.vmem [#allocation2], %s3679_s29 }
  0x9d   : > { %398 = vmatpush1.bf16.msra.mxu0 %v375_v31  ;;  %3524 = vmatpush3.bf16.msra.mxu1 %v381_v32  ;;  %s3232_s6 = sshll.u32 %s217_s5, 4  ;;  %s3233_s6 = int_to_ptr.vmem [resolvable:$true] %s3232_s6 }
  0x9e   : > { %v469_v34 = vpop.permute.xlu1 %468  ;;  %v467_v35 = vpop.permute.xlu0 %466  ;;  %2107 = vrot.lane.b32.xlu0 %v4034_v9, %s3871_s8  ;;  %2109 = vrot.lane.b32.xlu1 %v4036_v10, %s3871_s8 }
  0x9f   : > { %3529 = vmatprep.subr.bf16.mxu1 %v3852_v0  ;;  %v475_v36 = vsel %vm474_vm5, %v467_v35, %v469_v34 }
  0xa0   : > { %3351 = vmatmul.mubr.msk.bf16.vlgmr.msra.gmra.mxu0 %vm264_vm3, %v237_v33  ;;  %3526 = vmatmul.mubr.msk.bf16.vlgmr.msra.gmra.mxu1 %vm264_vm3, %v237_v33  ;;  %v482_v41 = vsel %vm268_vm2, %v475_v36, 0 }
  0xa1   : > { %522 = vmatprep.mubr.bf16.mxu0 %v3853_v1  ;;  %3531 = vmatprep.mubr.msk.bf16.mxu1 %vm3854_vm0, %v3852_v0 }
  0xa2   : > { %v473_v37 = vpop.permute.xlu1 %472  ;;  %v471_v38 = vpop.permute.xlu0 %470  ;;  %2111 = vrot.lane.b32.xlu0 %v4041_v12, %s3871_s8  ;;  %2113 = vrot.lane.b32.xlu1 %v4043_v13, %s3871_s8 }
  0xa3   : > { %v476_v39 = vsel %vm474_vm5, %v469_v34, %v471_v38  ;;  %v477_v40 = vsel %vm474_vm5, %v471_v38, %v473_v37  ;;  %v3373_v37 = vld [vmem:[%s4485_s1 + $0xe] sm:$0x3]  ;;  %vm2005_vm5 = vcmask 883712  }
  0xa4   : > { %v488_v42 = vsel %vm268_vm2, %v477_v40, 0  ;;  %3354 = vmatprep.subr.msk.bf16.mxu0 %vm268_vm2, %v476_v39 }
  0xa5   : > { %505 = vmatpush1.bf16.msra.mxu0 %v482_v41  ;;  %3530 = vmatpush3.bf16.msra.mxu1 %v488_v42 }
  0xa6   : > { %v579_v44 = vpop.permute.xlu1 %578  ;;  %v577_v45 = vpop.permute.xlu0 %576  ;;  %3535 = vmatprep.subr.bf16.mxu1 %v3852_v0  ;;  %2325 = vrot.lane.b32.xlu0 %v3971_v5, %s3872_s11 }
  0xa7   : > { %2327 = vrot.lane.b32.xlu1 %v3977_v7, %s3872_s11  ;;  %v585_v46 = vsel %vm584_vm6, %v577_v45, %v579_v44 }
  0xa8   : > { %3355 = vmatmul.mubr.msk.bf16.vlgmr.msra.gmra.mxu0 %vm264_vm3, %v3353_v43  ;;  %3532 = vmatmul.mubr.msk.bf16.vlgmr.msra.gmra.mxu1 %vm264_vm3, %v3353_v43  ;;  %v592_v51 = vsel %vm268_vm2, %v585_v46, 0 }
  0xa9   : > { %632 = vmatprep.mubr.bf16.mxu0 %v3853_v1  ;;  %3537 = vmatprep.mubr.msk.bf16.mxu1 %vm3854_vm0, %v3852_v0 }
  0xaa   : > { %v583_v47 = vpop.permute.xlu1 %582  ;;  %v581_v48 = vpop.permute.xlu0 %580  ;;  %2329 = vrot.lane.b32.xlu0 %v3969_v4, %s3872_s11 }
  0xab   : > { %v586_v49 = vsel %vm584_vm6, %v579_v44, %v581_v48  ;;  %v587_v50 = vsel %vm584_vm6, %v581_v48, %v583_v47  ;;  %2331 = vrot.lane.b32.xlu1 %v3975_v6, %s3872_s11  ;;  %v3377_v47 = vld [vmem:[%s4485_s1 + $0x10] sm:$0x3]  ;;  %vm2115_vm6 = vcmask 867328   ;;  %s3879_s11 = smov [#allocation2]  }
  0xac   : > { %v598_v52 = vsel %vm268_vm2, %v587_v50, 0  ;;  %3358 = vmatprep.subr.msk.bf16.mxu0 %vm268_vm2, %v586_v49  ;;  %s3778_s18 = sshll.u32 %s3879_s11, 4  ;;  %s3779_s18 = int_to_ptr.vmem [resolvable:$false] %s3778_s18 }
  0xad   : > { %615 = vmatpush1.bf16.msra.mxu0 %v592_v51  ;;  %3536 = vmatpush3.bf16.msra.mxu1 %v598_v52  ;;  %p3781_p1 = scmp.lt.s32.totalorder %s3233_s6, %s3779_s18 }
  0xae   : > { %v689_v54 = vpop.permute.xlu1 %688  ;;  %v687_v55 = vpop.permute.xlu0 %686  ;;  %3541 = vmatprep.subr.bf16.mxu1 %v3852_v0  ;;  %2435 = vrot.lane.b32.xlu0 %v3971_v5, %s3873_s21 }
  0xaf   : > { %2437 = vrot.lane.b32.xlu1 %v3977_v7, %s3873_s21  ;;  %v695_v56 = vsel %vm694_vm7, %v687_v55, %v689_v54  ;;  %v3381_v55 = vld [vmem:[%s4485_s1 + $0x12] sm:$0x3] }
  0xb0   : > { %3359 = vmatmul.mubr.msk.bf16.vlgmr.msra.gmra.mxu0 %vm264_vm3, %v3357_v53  ;;  %3538 = vmatmul.mubr.msk.bf16.vlgmr.msra.gmra.mxu1 %vm264_vm3, %v3357_v53  ;;  %v4117_v61 = vsel %vm268_vm2, %v695_v56, 0 }
  0xb1   : > { %742 = vmatprep.mubr.bf16.mxu0 %v3853_v1  ;;  %3543 = vmatprep.mubr.msk.bf16.mxu1 %vm3854_vm0, %v3852_v0 }
  0xb2   : > { %v693_v57 = vpop.permute.xlu1 %692  ;;  %v691_v58 = vpop.permute.xlu0 %690  ;;  %2439 = vrot.lane.b32.xlu0 %v3969_v4, %s3873_s21 }
  0xb3   : > { %v4113_v59 = vsel %vm694_vm7, %v689_v54, %v691_v58  ;;  %v697_v60 = vsel %vm694_vm7, %v691_v58, %v693_v57  ;;  %2441 = vrot.lane.b32.xlu1 %v3975_v6, %s3873_s21  ;;  %vm2333_vm7 = vcmask 1014784  }
  0xb4   : > { %v4120_v62 = vsel %vm268_vm2, %v697_v60, 0  ;;  %3362 = vmatprep.subr.msk.bf16.mxu0 %vm268_vm2, %v4113_v59 }
  0xb5   : > { %725 = vmatpush1.bf16.msra.mxu0 %v4117_v61  ;;  %3542 = vmatpush3.bf16.msra.mxu1 %v4120_v62 }
  0xb6   : > { %v799_v2 = vpop.permute.xlu1 %798  ;;  %v797_v3 = vpop.permute.xlu0 %796  ;;  %3547 = vmatprep.subr.bf16.mxu1 %v3852_v0  ;;  %2545 = vrot.lane.b32.xlu0 %v3971_v5, %s3874_s27 }
  0xb7   : > { %2547 = vrot.lane.b32.xlu1 %v3977_v7, %s3874_s27  ;;  %v805_v8 = vsel %vm804_vm8, %v797_v3, %v799_v2 }
  0xb8   : > { %3363 = vmatmul.mubr.msk.bf16.vlgmr.msra.gmra.mxu0 %vm264_vm3, %v3361_v63  ;;  %3544 = vmatmul.mubr.msk.bf16.vlgmr.msra.gmra.mxu1 %vm264_vm3, %v3361_v63  ;;  %v812_v17 = vsel %vm268_vm2, %v805_v8, 0  ;;  %v3385_v8 = vld [vmem:[%s4485_s1 + $0x14] sm:$0x3] }
  0xb9   : > { %852 = vmatprep.mubr.bf16.mxu0 %v3853_v1  ;;  %3549 = vmatprep.mubr.msk.bf16.mxu1 %vm3854_vm0, %v3852_v0 }
  0xba   : > { %v803_v11 = vpop.permute.xlu1 %802  ;;  %v801_v14 = vpop.permute.xlu0 %800  ;;  %2549 = vrot.lane.b32.xlu0 %v3969_v4, %s3874_s27 }
  0xbb   : > { %v806_v15 = vsel %vm804_vm8, %v799_v2, %v801_v14  ;;  %v807_v16 = vsel %vm804_vm8, %v801_v14, %v803_v11  ;;  %2551 = vrot.lane.b32.xlu1 %v3975_v6, %s3874_s27  ;;  %vm2443_vm8 = vcmask 982016  }
  0xbc   : > { %v818_v18 = vsel %vm268_vm2, %v807_v16, 0  ;;  %3366 = vmatprep.subr.msk.bf16.mxu0 %vm268_vm2, %v806_v15 }
  0xbd   : > { %835 = vmatpush1.bf16.msra.mxu0 %v812_v17  ;;  %3548 = vmatpush3.bf16.msra.mxu1 %v818_v18 }
  0xbe   : > { %v909_v20 = vpop.permute.xlu1 %908  ;;  %v907_v21 = vpop.permute.xlu0 %906  ;;  %3553 = vmatprep.subr.bf16.mxu1 %v3852_v0  ;;  %2744 = vrot.lane.b32.xlu0 %v3971_v5, %s3875_s4 }
  0xbf   : > { %2746 = vrot.lane.b32.xlu1 %v3977_v7, %s3875_s4  ;;  %v915_v22 = vsel %vm914_vm9, %v907_v21, %v909_v20 }
  0xc0   : > { %3367 = vmatmul.mubr.msk.bf16.vlgmr.msra.gmra.mxu0 %vm264_vm3, %v3365_v19  ;;  %3550 = vmatmul.mubr.msk.bf16.vlgmr.msra.gmra.mxu1 %vm264_vm3, %v3365_v19  ;;  %v922_v27 = vsel %vm268_vm2, %v915_v22, 0  ;;  %v3389_v22 = vld [vmem:[%s4485_s1 + $0x16] sm:$0x3] }
  0xc1   : > { %962 = vmatprep.mubr.bf16.mxu0 %v3853_v1  ;;  %3555 = vmatprep.mubr.msk.bf16.mxu1 %vm3854_vm0, %v3852_v0 }
  0xc2   : > { %v913_v23 = vpop.permute.xlu1 %912  ;;  %v911_v24 = vpop.permute.xlu0 %910  ;;  %2748 = vrot.lane.b32.xlu0 %v3969_v4, %s3875_s4 }
  0xc3   : > { %v916_v25 = vsel %vm914_vm9, %v909_v20, %v911_v24  ;;  %v917_v26 = vsel %vm914_vm9, %v911_v24, %v913_v23  ;;  %2750 = vrot.lane.b32.xlu1 %v3975_v6, %s3875_s4  ;;  %vm2553_vm9 = vcmask 261120   ;;  %s3681_s4 = smul.u32 192, %s3842_s15  ;;  %s3774_s15 = scalar_lea.vmem %s3233_s6, 192 }
  0xc4   : > { %v928_v28 = vsel %vm268_vm2, %v917_v26, 0  ;;  %3370 = vmatprep.subr.msk.bf16.mxu0 %vm268_vm2, %v916_v25  ;;  %p3775_p12 = scmp.ne.s32.totalorder %s3233_s6, %s3774_s15 }
  0xc5   : > { %945 = vmatpush1.bf16.msra.mxu0 %v922_v27  ;;  %3554 = vmatpush3.bf16.msra.mxu1 %v928_v28  ;;  %s3230_s9 = scalar_lea.hbm %s4487_s3, %s3681_s4 }
  0xc6   : > { %v1019_v30 = vpop.permute.xlu1 %1018  ;;  %v1017_v31 = vpop.permute.xlu0 %1016  ;;  %3559 = vmatprep.subr.bf16.mxu1 %v3852_v0  ;;  %2854 = vrot.lane.b32.xlu0 %v4034_v9, %s3876_s7  ;;  %p3776_p13 = pnand %p3775_p12, %p3940_p4 }
  0xc7   : > { %2856 = vrot.lane.b32.xlu1 %v4036_v10, %s3876_s7  ;;  %v1025_v4 = vsel %vm1024_vm10, %v1017_v31, %v1019_v30 }
  0xc8   : > { %3371 = vmatmul.mubr.msk.bf16.vlgmr.msra.gmra.mxu0 %vm264_vm3, %v3369_v29  ;;  %3556 = vmatmul.mubr.msk.bf16.vlgmr.msra.gmra.mxu1 %vm264_vm3, %v3369_v29  ;;  %v1032_v35 = vsel %vm268_vm2, %v1025_v4, 0  ;;  %v3393_v4 = vld [vmem:[%s4485_s1 + $0x18] sm:$0x3]  ;;  %p3777_p0 = pneg %p3776_p13 }
  0xc9   : > { %1072 = vmatprep.mubr.bf16.mxu0 %v3853_v1  ;;  %3561 = vmatprep.mubr.msk.bf16.mxu1 %vm3854_vm0, %v3852_v0 }
  0xca   : > { %v1023_v6 = vpop.permute.xlu1 %1022  ;;  %v1021_v32 = vpop.permute.xlu0 %1020  ;;  %2858 = vrot.lane.b32.xlu0 %v4041_v12, %s3876_s7 }
  0xcb   : > { %v1026_v33 = vsel %vm1024_vm10, %v1019_v30, %v1021_v32  ;;  %v1027_v34 = vsel %vm1024_vm10, %v1021_v32, %v1023_v6  ;;  %2860 = vrot.lane.b32.xlu1 %v4043_v13, %s3876_s7  ;;  %vm2752_vm10 = vcmask 195584  }
  0xcc   : > { %v1038_v36 = vsel %vm268_vm2, %v1027_v34, 0  ;;  %3374 = vmatprep.subr.msk.bf16.mxu0 %vm268_vm2, %v1026_v33 }
  0xcd   : > { %1055 = vmatpush1.bf16.msra.mxu0 %v1032_v35  ;;  %3560 = vmatpush3.bf16.msra.mxu1 %v1038_v36 }
  0xce   : > { %v1129_v38 = vpop.permute.xlu1 %1128  ;;  %v1127_v39 = vpop.permute.xlu0 %1126  ;;  %3565 = vmatprep.subr.bf16.mxu1 %v3852_v0  ;;  %2964 = vrot.lane.b32.xlu0 %v4034_v9, %s3877_s10 }
  0xcf   : > { %2966 = vrot.lane.b32.xlu1 %v4036_v10, %s3877_s10  ;;  %v1135_v40 = vsel %vm1134_vm11, %v1127_v39, %v1129_v38 }
  0xd0   : > { %3375 = vmatmul.mubr.msk.bf16.vlgmr.msra.gmra.mxu0 %vm264_vm3, %v3373_v37  ;;  %3562 = vmatmul.mubr.msk.bf16.vlgmr.msra.gmra.mxu1 %vm264_vm3, %v3373_v37  ;;  %v1142_v45 = vsel %vm268_vm2, %v1135_v40, 0 }
  0xd1   : > { %1182 = vmatprep.mubr.bf16.mxu0 %v3853_v1  ;;  %3567 = vmatprep.mubr.msk.bf16.mxu1 %vm3854_vm0, %v3852_v0 }
  0xd2   : > { %v1133_v41 = vpop.permute.xlu1 %1132  ;;  %v1131_v42 = vpop.permute.xlu0 %1130  ;;  %2968 = vrot.lane.b32.xlu0 %v4041_v12, %s3877_s10 }
  0xd3   : > { %v1136_v43 = vsel %vm1134_vm11, %v1129_v38, %v1131_v42  ;;  %v1137_v44 = vsel %vm1134_vm11, %v1131_v42, %v1133_v41  ;;  %2970 = vrot.lane.b32.xlu1 %v4043_v13, %s3877_s10  ;;  %v3397_v38 = vld [vmem:[%s4485_s1 + $0x1a] sm:$0x3]  ;;  %vm2862_vm11 = vcmask 523264   ;;  %s3216_s10 = scalar_lea.sflag [#allocation3], %s215_s28 }
  0xd4   : > { %v1148_v46 = vsel %vm268_vm2, %v1137_v44, 0  ;;  %3378 = vmatprep.subr.msk.bf16.mxu0 %vm268_vm2, %v1136_v43 }
  0xd5   : > { %1165 = vmatpush1.bf16.msra.mxu0 %v1142_v45  ;;  %3566 = vmatpush3.bf16.msra.mxu1 %v1148_v46 }
  0xd6   : > { %v1239_v48 = vpop.permute.xlu1 %1238  ;;  %v1237_v49 = vpop.permute.xlu0 %1236  ;;  %3571 = vmatprep.subr.bf16.mxu1 %v3852_v0  ;;  %3074 = vrot.lane.b32.xlu0 %v4034_v9, %s3878_s19 }
  0xd7   : > { %3076 = vrot.lane.b32.xlu1 %v4036_v10, %s3878_s19  ;;  %v1245_v50 = vsel %vm1244_vm12, %v1237_v49, %v1239_v48 }
  0xd8   : > { %3379 = vmatmul.mubr.msk.bf16.vlgmr.msra.gmra.mxu0 %vm264_vm3, %v3377_v47  ;;  %3568 = vmatmul.mubr.msk.bf16.vlgmr.msra.gmra.mxu1 %vm264_vm3, %v3377_v47  ;;  %v1252_v9 = vsel %vm268_vm2, %v1245_v50, 0 }
  0xd9   : > { %1292 = vmatprep.mubr.bf16.mxu0 %v3853_v1  ;;  %3573 = vmatprep.mubr.msk.bf16.mxu1 %vm3854_vm0, %v3852_v0 }
  0xda   : > { %v1243_v51 = vpop.permute.xlu1 %1242  ;;  %v1241_v52 = vpop.permute.xlu0 %1240  ;;  %3078 = vrot.lane.b32.xlu0 %v4041_v12, %s3878_s19 }
  0xdb   : > { %v1246_v53 = vsel %vm1244_vm12, %v1239_v48, %v1241_v52  ;;  %v1247_v54 = vsel %vm1244_vm12, %v1241_v52, %v1243_v51  ;;  %3080 = vrot.lane.b32.xlu1 %v4043_v13, %s3878_s19  ;;  %v3401_v48 = vld [vmem:[%s4485_s1 + $0x1c] sm:$0x3]  ;;  %vm2972_vm12 = vcmask 490496   ;;  %s3780_s19 = scalar_lea.vmem %s3779_s18, 384 }
  0xdc   : > { %v1258_v10 = vsel %vm268_vm2, %v1247_v54, 0  ;;  %3382 = vmatprep.subr.msk.bf16.mxu0 %vm268_vm2, %v1246_v53  ;;  %p3782_p2 = scmp.lt.s32.totalorder %s3780_s19, %s3774_s15 }
  0xdd   : > { %1275 = vmatpush1.bf16.msra.mxu0 %v1252_v9  ;;  %3572 = vmatpush3.bf16.msra.mxu1 %v1258_v10 }
  0xde   : > { %v1349_v56 = vpop.permute.xlu1 %1348  ;;  %v1347_v57 = vpop.permute.xlu0 %1346  ;;  %3577 = vmatprep.subr.bf16.mxu1 %v3852_v0  ;;  %p3783_p3 = por %p3782_p2, %p3781_p1 }
  0xdf   : > { %v1355_v12 = vsel %vm1354_vm13, %v1347_v57, %v1349_v56 }
  0xe0   : > { %3383 = vmatmul.mubr.msk.bf16.vlgmr.msra.gmra.mxu0 %vm264_vm3, %v3381_v55  ;;  %3574 = vmatmul.mubr.msk.bf16.vlgmr.msra.gmra.mxu1 %vm264_vm3, %v3381_v55  ;;  %v1362_v2 = vsel %vm268_vm2, %v1355_v12, 0  ;;  %v3405_v55 = vld [vmem:[%s4485_s1 + $0x1e] sm:$0x3]  ;;  %p3784_p5 = pnand %p3783_p3, %p3777_p0 }
  0xe1   : > { %1402 = vmatprep.mubr.bf16.mxu0 %v3853_v1  ;;  %3579 = vmatprep.mubr.msk.bf16.mxu1 %vm3854_vm0, %v3852_v0 }
  0xe2   : > { %v1353_v13 = vpop.permute.xlu1 %1352  ;;  %v1351_v58 = vpop.permute.xlu0 %1350 }
  0xe3   : > { %v1356_v60 = vsel %vm1354_vm13, %v1349_v56, %v1351_v58  ;;  %v1357_v63 = vsel %vm1354_vm13, %v1351_v58, %v1353_v13  ;;  %vm3082_vm13 = vcmask 457728  }
  0xe4   : > { %v1368_v3 = vsel %vm268_vm2, %v1357_v63, 0  ;;  %3386 = vmatprep.subr.msk.bf16.mxu0 %vm268_vm2, %v1356_v60 }
  0xe5   : > { %1385 = vmatpush1.bf16.msra.mxu0 %v1362_v2  ;;  %3578 = vmatpush3.bf16.msra.mxu1 %v1368_v3 }
  0xe6   : > { %v1459_v11 = vpop.permute.xlu1 %1458  ;;  %v1457_v14 = vpop.permute.xlu0 %1456  ;;  %3583 = vmatprep.subr.bf16.mxu1 %v3852_v0 }
  0xe7   : > { %v1465_v15 = vsel %vm1464_vm14, %v1457_v14, %v1459_v11 }
  0xe8   : > { %3387 = vmatmul.mubr.msk.bf16.vlgmr.msra.gmra.mxu0 %vm264_vm3, %v3385_v8  ;;  %3580 = vmatmul.mubr.msk.bf16.vlgmr.msra.gmra.mxu1 %vm264_vm3, %v3385_v8  ;;  %v1472_v20 = vsel %vm268_vm2, %v1465_v15, 0  ;;  %v3413_v8 = vld [vmem:[%s4485_s1 + $0x20] sm:$0x3] }
  0xe9   : > { %1512 = vmatprep.mubr.bf16.mxu0 %v3853_v1  ;;  %3585 = vmatprep.mubr.msk.bf16.mxu1 %vm3854_vm0, %v3852_v0 }
  0xea   : > { %v1463_v16 = vpop.permute.xlu1 %1462  ;;  %v1461_v17 = vpop.permute.xlu0 %1460 }
  0xeb   : > { %v1466_v18 = vsel %vm1464_vm14, %v1459_v11, %v1461_v17  ;;  %v1467_v19 = vsel %vm1464_vm14, %v1461_v17, %v1463_v16 }
  0xec   : > { %v1478_v21 = vsel %vm268_vm2, %v1467_v19, 0  ;;  %3390 = vmatprep.subr.msk.bf16.mxu0 %vm268_vm2, %v1466_v18  ;;  %v3773_v18 = vld [vmem:[%s3964_s30 + $0x8] ss:$0 sps:$4 sm:$0xff]  }
  0xed   : > { %1495 = vmatpush1.bf16.msra.mxu0 %v1472_v20  ;;  %3584 = vmatpush3.bf16.msra.mxu1 %v1478_v21  ;;  %v3417_v20 = vld [vmem:[%s4485_s1 + $0x22] sm:$0x3] }
  0xee   : > { %v1569_v23 = vpop.permute.xlu1 %1568  ;;  %v1567_v24 = vpop.permute.xlu0 %1566  ;;  %3589 = vmatprep.subr.bf16.mxu1 %v3852_v0 }
  0xef   : > { %v1575_v25 = vsel %vm1574_vm15, %v1567_v24, %v1569_v23 }
  0xf0   : > { %3391 = vmatmul.mubr.msk.bf16.vlgmr.msra.gmra.mxu0 %vm264_vm3, %v3389_v22  ;;  %3586 = vmatmul.mubr.msk.bf16.vlgmr.msra.gmra.mxu1 %vm264_vm3, %v3389_v22  ;;  %v1582_v30 = vsel %vm268_vm2, %v1575_v25, 0  ;;  %v2231_v22 = vsel %vm268_vm2, %v3971_v5, 0 }
  0xf1   : > { %1622 = vmatprep.mubr.bf16.mxu0 %v3853_v1  ;;  %3591 = vmatprep.mubr.msk.bf16.mxu1 %vm3854_vm0, %v3852_v0 }
  0xf2   : > { %v1573_v26 = vpop.permute.xlu1 %1572  ;;  %v1571_v27 = vpop.permute.xlu0 %1570 }
  0xf3   : > { %v1576_v28 = vsel %vm1574_vm15, %v1569_v23, %v1571_v27  ;;  %v1577_v29 = vsel %vm1574_vm15, %v1571_v27, %v1573_v26  ;;  %v2237_v23 = vsel %vm268_vm2, %v3773_v18, 0 }
  0xf4   : > { %v1588_v31 = vsel %vm268_vm2, %v1577_v29, 0  ;;  %3394 = vmatprep.subr.msk.bf16.mxu0 %vm268_vm2, %v1576_v28  ;;  %v3421_v28 = vld [vmem:[%s4485_s1 + $0x24] sm:$0x3] }
  0xf5   : > { %1605 = vmatpush1.bf16.msra.mxu0 %v1582_v30  ;;  %3590 = vmatpush3.bf16.msra.mxu1 %v1588_v31 }
  0xf6   : > { %3398 = vmatprep.subr.msk.bf16.mxu0 %vm268_vm2, %v4113_v59  ;;  %3595 = vmatprep.subr.bf16.mxu1 %v3852_v0  ;;  %v1766_v6 = vpop.permute.xlu0 %1765  ;;  %v1768_v32 = vpop.permute.xlu1 %1767 }
  0xf7   : > { %v1774_v35 = vsel %vm1773_vm1, %v1766_v6, %v1768_v32 }
  0xf8   : > { %3395 = vmatmul.mubr.msk.bf16.vlgmr.msra.gmra.mxu0 %vm264_vm3, %v3393_v4  ;;  %3592 = vmatmul.mubr.msk.bf16.vlgmr.msra.gmra.mxu1 %vm264_vm3, %v3393_v4  ;;  %v1781_v39 = vsel %vm268_vm2, %v1774_v35, 0 }
  0xf9   : > { %1694 = vmatpush1.bf16.msra.mxu0 %v4117_v61  ;;  %3596 = vmatpush3.bf16.msra.mxu1 %v4120_v62 }
  0xfa   : > { %v1770_v33 = vpop.permute.xlu0 %1769  ;;  %1711 = vmatprep.mubr.bf16.mxu0 %v3853_v1  ;;  %3597 = vmatprep.mubr.msk.bf16.mxu1 %vm3854_vm0, %v3852_v0  ;;  %v1772_v34 = vpop.permute.xlu1 %1771 }
  0xfb   : > { %v1775_v36 = vsel %vm1773_vm1, %v1768_v32, %v1770_v33  ;;  %v1776_v37 = vsel %vm1773_vm1, %v1770_v33, %v1772_v34  ;;  %3601 = vmatprep.subr.bf16.mxu1 %v3852_v0 }
  0xfc   : > { %3402 = vmatprep.subr.msk.bf16.mxu0 %vm268_vm2, %v1775_v36  ;;  %v1787_v40 = vsel %vm268_vm2, %v1776_v37, 0  ;;  %v3428_v36 = vld [vmem:[%s4485_s1 + $0x26] sm:$0x3] }
  0xfe   : > { %v1888_v41 = vpop.permute.xlu0 %1887  ;;  %v1890_v42 = vpop.permute.xlu1 %1889 }
  0xff   : > { %v1896_v45 = vsel %vm1895_vm4, %v1888_v41, %v1890_v42 }
 0x100   : > { %3399 = vmatmul.mubr.msk.bf16.vlgmr.msra.gmra.mxu0 %vm264_vm3, %v3397_v38  ;;  %3598 = vmatmul.mubr.msk.bf16.vlgmr.msra.gmra.mxu1 %vm264_vm3, %v3397_v38  ;;  %v1903_v49 = vsel %vm268_vm2, %v1896_v45, 0 }
 0x101   : > { %1804 = vmatpush1.bf16.msra.mxu0 %v1781_v39  ;;  %3602 = vmatpush3.bf16.msra.mxu1 %v1787_v40  ;;  %v3186_v40 = vld [vmem:[%s4486_s2] sm:$0xf] }
 0x102   : > { %v1892_v43 = vpop.permute.xlu0 %1891  ;;  %1821 = vmatprep.mubr.bf16.mxu0 %v3853_v1  ;;  %3603 = vmatprep.mubr.msk.bf16.mxu1 %vm3854_vm0, %v3852_v0  ;;  %v1894_v44 = vpop.permute.xlu1 %1893 }
 0x103   : > { %v1897_v46 = vsel %vm1895_vm4, %v1890_v42, %v1892_v43  ;;  %v1898_v47 = vsel %vm1895_vm4, %v1892_v43, %v1894_v44  ;;  %3607 = vmatprep.subr.bf16.mxu1 %v3852_v0  ;;  %3189 = vperm.xlu0 %3764, %v3186_v40  }
 0x104   : > { %3410 = vmatprep.subr.msk.bf16.mxu0 %vm268_vm2, %v1897_v46  ;;  %v1909_v50 = vsel %vm268_vm2, %v1898_v47, 0  ;;  %v3432_v47 = vld [vmem:[%s4485_s1 + $0x28] sm:$0x3] }
 0x106   : > { %v1998_v51 = vpop.permute.xlu0 %1997 }
 0x108   : > { %3403 = vmatmul.mubr.msk.bf16.vlgmr.msra.gmra.mxu0 %vm264_vm3, %v3401_v48  ;;  %3604 = vmatmul.mubr.msk.bf16.vlgmr.msra.gmra.mxu1 %vm264_vm3, %v3401_v48  ;;  %v2000_v52 = vpop.permute.xlu1 %1999 }
 0x109   : > { %1926 = vmatpush1.bf16.msra.mxu0 %v1903_v49  ;;  %3608 = vmatpush3.bf16.msra.mxu1 %v1909_v50  ;;  %v2006_v53 = vsel %vm2005_vm5, %v1998_v51, %v2000_v52 }
 0x10a   : > { %1943 = vmatprep.mubr.bf16.mxu0 %v3853_v1  ;;  %3609 = vmatprep.mubr.msk.bf16.mxu1 %vm3854_vm0, %v3852_v0  ;;  %v2013_v57 = vsel %vm268_vm2, %v2006_v53, 0  ;;  %v3436_v53 = vld [vmem:[%s4485_s1 + $0x2a] sm:$0x3] }
 0x10b   : > { %v2002_v54 = vpop.permute.xlu0 %2001  ;;  %3613 = vmatprep.subr.bf16.mxu1 %v3852_v0 }
 0x10c   : > { %v2007_v9 = vsel %vm2005_vm5, %v2000_v52, %v2002_v54  ;;  %v2004_v10 = vpop.permute.xlu1 %2003 }
 0x10d   : > { %3414 = vmatprep.subr.msk.bf16.mxu0 %vm268_vm2, %v2007_v9  ;;  %v2008_v56 = vsel %vm2005_vm5, %v2002_v54, %v2004_v10 }
 0x10e   : > { %v2019_v12 = vsel %vm268_vm2, %v2008_v56, 0 }
 0x110   : > { %3411 = vmatmul.mubr.msk.bf16.vlgmr.msra.gmra.mxu0 %vm264_vm3, %v3405_v55  ;;  %3610 = vmatmul.mubr.msk.bf16.vlgmr.msra.gmra.mxu1 %vm264_vm3, %v3405_v55  ;;  %v2108_v13 = vpop.permute.xlu0 %2107  ;;  %v2110_v58 = vpop.permute.xlu1 %2109 }
 0x111   : > { %2036 = vmatpush1.bf16.msra.mxu0 %v2013_v57  ;;  %3614 = vmatpush3.bf16.msra.mxu1 %v2019_v12  ;;  %v2116_v60 = vsel %vm2115_vm6, %v2108_v13, %v2110_v58  ;;  %v3440_v57 = vld [vmem:[%s4485_s1 + $0x2c] sm:$0x3] }
 0x112   : > { %2053 = vmatprep.mubr.bf16.mxu0 %v3853_v1  ;;  %3615 = vmatprep.mubr.msk.bf16.mxu1 %vm3854_vm0, %v3852_v0  ;;  %v2123_v14 = vsel %vm268_vm2, %v2116_v60, 0 }
 0x113   : > { %3619 = vmatprep.subr.bf16.mxu1 %v3852_v0 }
 0x114   : > { %v2112_v63 = vpop.permute.xlu0 %2111  ;;  %v2114_v2 = vpop.permute.xlu1 %2113 }
 0x115   : > { %v2117_v3 = vsel %vm2115_vm6, %v2110_v58, %v2112_v63  ;;  %v2118_v11 = vsel %vm2115_vm6, %v2112_v63, %v2114_v2 }
 0x116   : > { %3418 = vmatprep.subr.msk.bf16.mxu0 %vm268_vm2, %v2117_v3  ;;  %v2129_v15 = vsel %vm268_vm2, %v2118_v11, 0  ;;  %v3444_v3 = vld [vmem:[%s4485_s1 + $0x2e] sm:$0x3] }
 0x118   : > { %3415 = vmatmul.mubr.msk.bf16.vlgmr.msra.gmra.mxu0 %vm264_vm3, %v3413_v8  ;;  %3616 = vmatmul.mubr.msk.bf16.vlgmr.msra.gmra.mxu1 %vm264_vm3, %v3413_v8  ;;  %v2326_v16 = vpop.permute.xlu0 %2325 }
 0x119   : > { %2146 = vmatpush1.bf16.msra.mxu0 %v2123_v14  ;;  %3620 = vmatpush3.bf16.msra.mxu1 %v2129_v15  ;;  %v2328_v17 = vpop.permute.xlu1 %2327 }
 0x11a   : > { %2163 = vmatprep.mubr.bf16.mxu0 %v3853_v1  ;;  %3621 = vmatprep.mubr.msk.bf16.mxu1 %vm3854_vm0, %v3852_v0  ;;  %v2334_v26 = vsel %vm2333_vm7, %v2326_v16, %v2328_v17 }
 0x11b   : > { %3425 = vmatprep.subr.msk.bf16.mxu0 %vm268_vm2, %v3977_v7  ;;  %3625 = vmatprep.subr.bf16.mxu1 %v3852_v0  ;;  %v2341_v30 = vsel %vm268_vm2, %v2334_v26, 0 }
 0x11c   : > { %v2330_v19 = vpop.permute.xlu0 %2329 }
 0x11d   : > { %v2332_v21 = vpop.permute.xlu1 %2331  ;;  %v2335_v24 = vsel %vm2333_vm7, %v2328_v17, %v2330_v19 }
 0x11e   : > { %v2336_v5 = vsel %vm2333_vm7, %v2330_v19, %v2332_v21  ;;  %v3448_v19 = vld [vmem:[%s4485_s1 + $0x30] sm:$0x3] }
 0x11f   : > { %v2347_v31 = vsel %vm268_vm2, %v2336_v5, 0 }
 0x120   : > { %3419 = vmatmul.mubr.msk.bf16.vlgmr.msra.gmra.mxu0 %vm264_vm3, %v3417_v20  ;;  %3622 = vmatmul.mubr.msk.bf16.vlgmr.msra.gmra.mxu1 %vm264_vm3, %v3417_v20  ;;  %v2436_v7 = vpop.permute.xlu0 %2435 }
 0x121   : > { %2254 = vmatpush1.bf16.msra.mxu0 %v2231_v22  ;;  %3626 = vmatpush3.bf16.msra.mxu1 %v2237_v23  ;;  %v2438_v25 = vpop.permute.xlu1 %2437 }
 0x122   : > { %2271 = vmatprep.mubr.bf16.mxu0 %v3853_v1  ;;  %3627 = vmatprep.mubr.msk.bf16.mxu1 %vm3854_vm0, %v3852_v0  ;;  %v2444_v33 = vsel %vm2443_vm8, %v2436_v7, %v2438_v25 }
 0x123   : > { %3429 = vmatprep.subr.msk.bf16.mxu0 %vm268_vm2, %v2335_v24  ;;  %3631 = vmatprep.subr.bf16.mxu1 %v3852_v0  ;;  %v2451_v38 = vsel %vm268_vm2, %v2444_v33, 0 }
 0x124   : > { %v2440_v27 = vpop.permute.xlu0 %2439 }
 0x125   : > { %v2442_v29 = vpop.permute.xlu1 %2441  ;;  %v2445_v4 = vsel %vm2443_vm8, %v2438_v25, %v2440_v27 }
 0x126   : > { %v2446_v34 = vsel %vm2443_vm8, %v2440_v27, %v2442_v29 }
 0x127   : > { %v2457_v39 = vsel %vm268_vm2, %v2446_v34, 0 }
 0x128   : > { %3426 = vmatmul.mubr.msk.bf16.vlgmr.msra.gmra.mxu0 %vm264_vm3, %v3421_v28  ;;  %3628 = vmatmul.mubr.msk.bf16.vlgmr.msra.gmra.mxu1 %vm264_vm3, %v3421_v28  ;;  %v2546_v6 = vpop.permute.xlu0 %2545 }
 0x129   : > { %2364 = vmatpush1.bf16.msra.mxu0 %v2341_v30  ;;  %3632 = vmatpush3.bf16.msra.mxu1 %v2347_v31  ;;  %v2548_v32 = vpop.permute.xlu1 %2547  ;;  %v3452_v31 = vld [vmem:[%s4485_s1 + $0x32] sm:$0x3] }
 0x12a   : > { %2381 = vmatprep.mubr.bf16.mxu0 %v3853_v1  ;;  %3633 = vmatprep.mubr.msk.bf16.mxu1 %vm3854_vm0, %v3852_v0  ;;  %v2554_v44 = vsel %vm2553_vm9, %v2546_v6, %v2548_v32 }
 0x12b   : > { %3433 = vmatprep.subr.msk.bf16.mxu0 %vm268_vm2, %v2445_v4  ;;  %3637 = vmatprep.subr.bf16.mxu1 %v3852_v0  ;;  %v2561_v49 = vsel %vm268_vm2, %v2554_v44, 0 }
 0x12c   : > { %v2550_v35 = vpop.permute.xlu0 %2549 }
 0x12d   : > { %v2552_v37 = vpop.permute.xlu1 %2551  ;;  %v2555_v41 = vsel %vm2553_vm9, %v2548_v32, %v2550_v35 }
 0x12e   : > { %v2556_v45 = vsel %vm2553_vm9, %v2550_v35, %v2552_v37 }
 0x12f   : > { %v2567_v50 = vsel %vm268_vm2, %v2556_v45, 0 }
 0x130   : > { %3430 = vmatmul.mubr.msk.bf16.vlgmr.msra.gmra.mxu0 %vm264_vm3, %v3428_v36  ;;  %3634 = vmatmul.mubr.msk.bf16.vlgmr.msra.gmra.mxu1 %vm264_vm3, %v3428_v36  ;;  %v2745_v42 = vpop.permute.xlu0 %2744 }
 0x131   : > { %2474 = vmatpush1.bf16.msra.mxu0 %v2451_v38  ;;  %3638 = vmatpush3.bf16.msra.mxu1 %v2457_v39  ;;  %v2747_v43 = vpop.permute.xlu1 %2746 }
 0x132   : > { %2491 = vmatprep.mubr.bf16.mxu0 %v3853_v1  ;;  %3639 = vmatprep.mubr.msk.bf16.mxu1 %vm3854_vm0, %v3852_v0 }
 0x133   : > { %3437 = vmatprep.subr.msk.bf16.mxu0 %vm268_vm2, %v2555_v41  ;;  %3643 = vmatprep.subr.bf16.mxu1 %v3852_v0 }
 0x134   : > { %v2749_v46 = vpop.permute.xlu0 %2748 }
 0x135   : > { %v2751_v48 = vpop.permute.xlu1 %2750  ;;  %v2754_v10 = vsel %vm2752_vm10, %v2747_v43, %v2749_v46 }
 0x136   : > { %v2755_v55 = vsel %vm2752_vm10, %v2749_v46, %v2751_v48 }
 0x137   : > { %v2766_v12 = vsel %vm268_vm2, %v2755_v55, 0 }
 0x138   : > { %3434 = vmatmul.mubr.msk.bf16.vlgmr.msra.gmra.mxu0 %vm264_vm3, %v3432_v47  ;;  %3640 = vmatmul.mubr.msk.bf16.vlgmr.msra.gmra.mxu1 %vm264_vm3, %v3432_v47  ;;  %v2855_v51 = vpop.permute.xlu0 %2854 }
 0x139   : > { %2584 = vmatpush1.bf16.msra.mxu0 %v2561_v49  ;;  %3644 = vmatpush3.bf16.msra.mxu1 %v2567_v50  ;;  %v2857_v52 = vpop.permute.xlu1 %2856 }
 0x13a   : > { %3441 = vmatprep.subr.msk.bf16.mxu0 %vm268_vm2, %v4113_v59  ;;  %2601 = vmatprep.mubr.bf16.mxu0 %v3853_v1  ;;  %v2753_v59 = vsel %vm2752_vm10, %v2745_v42, %v2747_v43  ;;  %v2863_v60 = vsel %vm2862_vm11, %v2855_v51, %v2857_v52  ;;  %v3456_v43 = vld [vmem:[%s4485_s1 + $0x34] sm:$0x3] }
 0x13b   : > { %3645 = vmatprep.mubr.msk.bf16.mxu1 %vm3854_vm0, %v3852_v0  ;;  %3649 = vmatprep.subr.bf16.mxu1 %v3852_v0  ;;  %v2870_v8 = vsel %vm268_vm2, %v2863_v60, 0 }
 0x13c   : > { %v2859_v54 = vpop.permute.xlu0 %2858 }
 0x13d   : > { %v2861_v9 = vpop.permute.xlu1 %2860  ;;  %v2864_v13 = vsel %vm2862_vm11, %v2857_v52, %v2859_v54 }
 0x13e   : > { %v2865_v63 = vsel %vm2862_vm11, %v2859_v54, %v2861_v9 }
 0x13f   : > { %v2876_v11 = vsel %vm268_vm2, %v2865_v63, 0 }
 0x140   : > { %3438 = vmatmul.mubr.msk.bf16.vlgmr.msra.gmra.mxu0 %vm264_vm3, %v3436_v53  ;;  %3646 = vmatmul.mubr.msk.bf16.vlgmr.msra.gmra.mxu1 %vm264_vm3, %v3436_v53  ;;  %v2965_v56 = vpop.permute.xlu0 %2964 }
 0x141   : > { %2673 = vmatpush1.bf16.msra.mxu0 %v4117_v61  ;;  %3650 = vmatpush3.bf16.msra.mxu1 %v4120_v62  ;;  %v2967_v61 = vpop.permute.xlu1 %2966  ;;  %v2760_v62 = vsel %vm268_vm2, %v2753_v59, 0 }
 0x142   : > { %2690 = vmatprep.mubr.bf16.mxu0 %v3853_v1  ;;  %3651 = vmatprep.mubr.msk.bf16.mxu1 %vm3854_vm0, %v3852_v0  ;;  %v2973_v17 = vsel %vm2972_vm12, %v2965_v56, %v2967_v61 }
 0x143   : > { %3445 = vmatprep.subr.msk.bf16.mxu0 %vm268_vm2, %v2754_v10  ;;  %3655 = vmatprep.subr.bf16.mxu1 %v3852_v0  ;;  %v2980_v21 = vsel %vm268_vm2, %v2973_v17, 0 }
 0x144   : > { %v2969_v58 = vpop.permute.xlu0 %2968 }
 0x145   : > { %v2971_v2 = vpop.permute.xlu1 %2970  ;;  %v2974_v15 = vsel %vm2972_vm12, %v2967_v61, %v2969_v58 }
 0x146   : > { %v2975_v18 = vsel %vm2972_vm12, %v2969_v58, %v2971_v2 }
 0x147   : > { %v2986_v22 = vsel %vm268_vm2, %v2975_v18, 0 }
 0x148   : > { %3442 = vmatmul.mubr.msk.bf16.vlgmr.msra.gmra.mxu0 %vm264_vm3, %v3440_v57  ;;  %3652 = vmatmul.mubr.msk.bf16.vlgmr.msra.gmra.mxu1 %vm264_vm3, %v3440_v57  ;;  %v3075_v14 = vpop.permute.xlu0 %3074 }
 0x149   : > { %2783 = vmatpush1.bf16.msra.mxu0 %v2760_v62  ;;  %3656 = vmatpush3.bf16.msra.mxu1 %v2766_v12  ;;  %v3077_v16 = vpop.permute.xlu1 %3076 }
 0x14a   : > { %2800 = vmatprep.mubr.bf16.mxu0 %v3853_v1  ;;  %3657 = vmatprep.mubr.msk.bf16.mxu1 %vm3854_vm0, %v3852_v0  ;;  %v3083_v27 = vsel %vm3082_vm13, %v3075_v14, %v3077_v16 }
 0x14b   : > { %3449 = vmatprep.subr.msk.bf16.mxu0 %vm268_vm2, %v2864_v13  ;;  %3661 = vmatprep.subr.bf16.mxu1 %v3852_v0  ;;  %v3090_v6 = vsel %vm268_vm2, %v3083_v27, 0 }
 0x14c   : > { %v3079_v20 = vpop.permute.xlu0 %3078 }
 0x14d   : > { %v3081_v23 = vpop.permute.xlu1 %3080  ;;  %v3084_v25 = vsel %vm3082_vm13, %v3077_v16, %v3079_v20 }
 0x14e   : > { %v3085_v28 = vsel %vm3082_vm13, %v3079_v20, %v3081_v23 }
 0x14f   : > { %v3096_v33 = vsel %vm268_vm2, %v3085_v28, 0 }
 0x150   : > { %3446 = vmatmul.mubr.msk.bf16.vlgmr.msra.gmra.mxu0 %vm264_vm3, %v3444_v3  ;;  %3658 = vmatmul.mubr.msk.bf16.vlgmr.msra.gmra.mxu1 %vm264_vm3, %v3444_v3 }
 0x151   : > { %2893 = vmatpush1.bf16.msra.mxu0 %v2870_v8  ;;  %3662 = vmatpush3.bf16.msra.mxu1 %v2876_v11 }
 0x152   : > { %2910 = vmatprep.mubr.bf16.mxu0 %v3853_v1  ;;  %3663 = vmatprep.mubr.msk.bf16.mxu1 %vm3854_vm0, %v3852_v0 }
 0x153   : > { %3453 = vmatprep.subr.msk.bf16.mxu0 %vm268_vm2, %v2974_v15  ;;  %3667 = vmatprep.subr.bf16.mxu1 %v3852_v0 }
 0x158   : > { %v312_v24 = vpop.f32.mrf.mxu0  ;;  %v353_v7 = vpop.f32.mrf.mxu1  ;;  %3450 = vmatmul.mubr.msk.bf16.vlgmr.msra.gmra.mxu0 %vm264_vm3, %v3448_v19  ;;  %3664 = vmatmul.mubr.msk.bf16.vlgmr.msra.gmra.mxu1 %vm264_vm3, %v3448_v19 }
 0x159   : > { %3003 = vmatpush1.bf16.msra.mxu0 %v2980_v21  ;;  %3668 = vmatpush3.bf16.msra.mxu1 %v2986_v22 }
 0x15a   : > { %v3521_v26 = vpop.f32.mrf.mxu1  ;;  %v314_v5 = vpop.f32.mrf.mxu0  ;;  %3020 = vmatprep.mubr.bf16.mxu0 %v3853_v1  ;;  %3669 = vmatprep.mubr.msk.bf16.mxu1 %vm3854_vm0, %v3852_v0 }
 0x15b   : > { %3457 = vmatprep.subr.msk.bf16.mxu0 %vm268_vm2, %v3084_v25  ;;  %3673 = vmatprep.subr.bf16.mxu1 %v3852_v0 }
 0x15c   : > { %v316_v29 = vpop.f32.mrf.mxu0  ;;  %v356_v30 = vpop.f32.mrf.mxu1 }
 0x15e   : > { %v3522_v4 = vpop.f32.mrf.mxu1  ;;  %v317_v32 = vpop.f32.mrf.mxu0 }
 0x160   : > { %v417_v34 = vpop.f32.mrf.mxu0  ;;  %v458_v35 = vpop.f32.mrf.mxu1  ;;  %3454 = vmatmul.mubr.msk.bf16.vlgmr.msra.gmra.mxu0 %vm264_vm3, %v3452_v31  ;;  %3670 = vmatmul.mubr.msk.bf16.vlgmr.msra.gmra.mxu1 %vm264_vm3, %v3452_v31 }
 0x161   : > { %v418_v36 = vadd.f32 %v417_v34, %v312_v24  ;;  %v459_v37 = vadd.f32 %v458_v35, %v353_v7  ;;  %3113 = vmatpush1.bf16.msra.mxu0 %v3090_v6  ;;  %3674 = vmatpush3.bf16.msra.mxu1 %v3096_v33 }
 0x162   : > { %v419_v38 = vpop.f32.mrf.mxu0  ;;  %v3527_v39 = vpop.f32.mrf.mxu1  ;;  %3130 = vmatprep.mubr.bf16.mxu0 %v3853_v1  ;;  %3675 = vmatprep.mubr.msk.bf16.mxu1 %vm3854_vm0, %v3852_v0 }
 0x163   : > { %v420_v40 = vadd.f32 %v419_v38, %v314_v5 }
 0x164   : > { %v421_v41 = vpop.f32.mrf.mxu0  ;;  %v461_v42 = vpop.f32.mrf.mxu1 }
 0x166   : > { %v422_v44 = vpop.f32.mrf.mxu0  ;;  %v3528_v45 = vpop.f32.mrf.mxu1 }
 0x168   : > { %v524_v46 = vpop.f32.mrf.mxu0  ;;  %v565_v47 = vpop.f32.mrf.mxu1  ;;  %3458 = vmatmul.mubr.msk.bf16.vlgmr.msra.gmra.mxu0 %vm264_vm3, %v3456_v43  ;;  %3676 = vmatmul.mubr.msk.bf16.vlgmr.msra.gmra.mxu1 %vm264_vm3, %v3456_v43 }
 0x169   : > { %v571_v48 = vadd.f32 %v524_v46, %v418_v36  ;;  %v573_v1 = vadd.f32 %v565_v47, %v459_v37 }
 0x16a   : > { %v526_v49 = vpop.f32.mrf.mxu0  ;;  %v3533_v50 = vpop.f32.mrf.mxu1 }
 0x16b   : > { %v572_v0 = vadd.f32 %v526_v49, %v420_v40 }
 0x16c   : > { %v528_v51 = vpop.f32.mrf.mxu0  ;;  %v568_v52 = vpop.f32.mrf.mxu1 }
 0x16e   : > { %v529_v53 = vpop.f32.mrf.mxu0  ;;  %v3534_v54 = vpop.f32.mrf.mxu1 }
 0x170   : > { %v634_v9 = vpop.f32.mrf.mxu0  ;;  %v675_v10 = vpop.f32.mrf.mxu1 }
 0x171   : > { %v681_v59 = vadd.f32 %v634_v9, %v571_v48  ;;  %v683_v55 = vadd.f32 %v675_v10, %v573_v1 }
 0x172   : > { %v636_v56 = vpop.f32.mrf.mxu0  ;;  %v3539_v57 = vpop.f32.mrf.mxu1 }
 0x173   : > { %v682_v61 = vadd.f32 %v636_v56, %v572_v0 }
 0x174   : > { %v638_v62 = vpop.f32.mrf.mxu0  ;;  %v678_v12 = vpop.f32.mrf.mxu1 }
 0x176   : > { %v639_v13 = vpop.f32.mrf.mxu0  ;;  %v3540_v58 = vpop.f32.mrf.mxu1 }
 0x178   : > { %v744_v60 = vpop.f32.mrf.mxu0  ;;  %v785_v63 = vpop.f32.mrf.mxu1 }
 0x179   : > { %v791_v2 = vadd.f32 %v744_v60, %v681_v59  ;;  %v793_v3 = vadd.f32 %v785_v63, %v683_v55 }
 0x17a   : > { %v746_v8 = vpop.f32.mrf.mxu0  ;;  %v3545_v11 = vpop.f32.mrf.mxu1 }
 0x17b   : > { %v792_v14 = vadd.f32 %v746_v8, %v682_v61 }
 0x17c   : > { %v748_v15 = vpop.f32.mrf.mxu0  ;;  %v788_v16 = vpop.f32.mrf.mxu1 }
 0x17e   : > { %v749_v17 = vpop.f32.mrf.mxu0  ;;  %v3546_v18 = vpop.f32.mrf.mxu1 }
 0x180   : > { %v854_v19 = vpop.f32.mrf.mxu0  ;;  %v895_v20 = vpop.f32.mrf.mxu1 }
 0x181   : > { %v901_v21 = vadd.f32 %v854_v19, %v791_v2  ;;  %v903_v22 = vadd.f32 %v895_v20, %v793_v3 }
 0x182   : > { %v856_v23 = vpop.f32.mrf.mxu0  ;;  %v3551_v24 = vpop.f32.mrf.mxu1 }
 0x183   : > { %v902_v7 = vadd.f32 %v856_v23, %v792_v14 }
 0x184   : > { %v858_v25 = vpop.f32.mrf.mxu0  ;;  %v898_v26 = vpop.f32.mrf.mxu1 }
 0x186   : > { %v859_v5 = vpop.f32.mrf.mxu0  ;;  %v3552_v27 = vpop.f32.mrf.mxu1 }
 0x188   : > { %v964_v28 = vpop.f32.mrf.mxu0  ;;  %v1005_v29 = vpop.f32.mrf.mxu1 }
 0x189   : > { %v1011_v30 = vadd.f32 %v964_v28, %v901_v21  ;;  %v1013_v31 = vadd.f32 %v1005_v29, %v903_v22 }
 0x18a   : > { %v966_v4 = vpop.f32.mrf.mxu0  ;;  %v3557_v6 = vpop.f32.mrf.mxu1 }
 0x18b   : > { %v1012_v32 = vadd.f32 %v966_v4, %v902_v7 }
 0x18c   : > { %v968_v33 = vpop.f32.mrf.mxu0  ;;  %v1008_v34 = vpop.f32.mrf.mxu1 }
 0x18e   : > { %v969_v35 = vpop.f32.mrf.mxu0  ;;  %v3558_v36 = vpop.f32.mrf.mxu1 }
 0x190   : > { %v1074_v37 = vpop.f32.mrf.mxu0  ;;  %v1115_v38 = vpop.f32.mrf.mxu1 }
 0x191   : > { %v1121_v39 = vadd.f32 %v1074_v37, %v1011_v30  ;;  %v1123_v40 = vadd.f32 %v1115_v38, %v1013_v31 }
 0x192   : > { %v1076_v41 = vpop.f32.mrf.mxu0  ;;  %v3563_v42 = vpop.f32.mrf.mxu1 }
 0x193   : > { %v1122_v43 = vadd.f32 %v1076_v41, %v1012_v32 }
 0x194   : > { %v1078_v44 = vpop.f32.mrf.mxu0  ;;  %v1118_v45 = vpop.f32.mrf.mxu1 }
 0x196   : > { %v1079_v46 = vpop.f32.mrf.mxu0  ;;  %v3564_v47 = vpop.f32.mrf.mxu1 }
 0x198   : > { %v1184_v48 = vpop.f32.mrf.mxu0  ;;  %v1225_v1 = vpop.f32.mrf.mxu1 }
 0x199   : > { %v1231_v49 = vadd.f32 %v1184_v48, %v1121_v39  ;;  %v1233_v50 = vadd.f32 %v1225_v1, %v1123_v40 }
 0x19a   : > { %v1186_v0 = vpop.f32.mrf.mxu0  ;;  %v3569_v51 = vpop.f32.mrf.mxu1 }
 0x19b   : > { %v1232_v52 = vadd.f32 %v1186_v0, %v1122_v43 }
 0x19c   : > { %v1188_v53 = vpop.f32.mrf.mxu0  ;;  %v1228_v54 = vpop.f32.mrf.mxu1 }
 0x19e   : > { %v1189_v9 = vpop.f32.mrf.mxu0  ;;  %v3570_v10 = vpop.f32.mrf.mxu1 }
 0x1a0   : > { %v1294_v59 = vpop.f32.mrf.mxu0  ;;  %v1335_v55 = vpop.f32.mrf.mxu1 }
 0x1a1   : > { %v1341_v56 = vadd.f32 %v1294_v59, %v1231_v49  ;;  %v1343_v57 = vadd.f32 %v1335_v55, %v1233_v50 }
 0x1a2   : > { %v1296_v61 = vpop.f32.mrf.mxu0  ;;  %v3575_v62 = vpop.f32.mrf.mxu1 }
 0x1a3   : > { %v1342_v12 = vadd.f32 %v1296_v61, %v1232_v52 }
 0x1a4   : > { %v1298_v13 = vpop.f32.mrf.mxu0  ;;  %v1338_v58 = vpop.f32.mrf.mxu1 }
 0x1a6   : > { %v1299_v60 = vpop.f32.mrf.mxu0  ;;  %v3576_v63 = vpop.f32.mrf.mxu1 }
 0x1a8   : > { %v1404_v2 = vpop.f32.mrf.mxu0  ;;  %v1445_v3 = vpop.f32.mrf.mxu1 }
 0x1a9   : > { %v1451_v8 = vadd.f32 %v1404_v2, %v1341_v56  ;;  %v1453_v11 = vadd.f32 %v1445_v3, %v1343_v57 }
 0x1aa   : > { %v1406_v14 = vpop.f32.mrf.mxu0  ;;  %v3581_v15 = vpop.f32.mrf.mxu1 }
 0x1ab   : > { %v1452_v16 = vadd.f32 %v1406_v14, %v1342_v12 }
 0x1ac   : > { %v1408_v17 = vpop.f32.mrf.mxu0  ;;  %v1448_v18 = vpop.f32.mrf.mxu1 }
 0x1ae   : > { %v1409_v19 = vpop.f32.mrf.mxu0  ;;  %v3582_v20 = vpop.f32.mrf.mxu1 }
 0x1b0   : > { %v1514_v21 = vpop.f32.mrf.mxu0  ;;  %v1555_v22 = vpop.f32.mrf.mxu1 }
 0x1b1   : > { %v1561_v23 = vadd.f32 %v1514_v21, %v1451_v8  ;;  %v1563_v24 = vadd.f32 %v1555_v22, %v1453_v11 }
 0x1b2   : > { %v1516_v7 = vpop.f32.mrf.mxu0  ;;  %v3587_v25 = vpop.f32.mrf.mxu1 }
 0x1b3   : > { %v1562_v26 = vadd.f32 %v1516_v7, %v1452_v16 }
 0x1b4   : > { %v1518_v5 = vpop.f32.mrf.mxu0  ;;  %v1558_v27 = vpop.f32.mrf.mxu1 }
 0x1b6   : > { %v1519_v28 = vpop.f32.mrf.mxu0  ;;  %v3588_v29 = vpop.f32.mrf.mxu1 }
 0x1b8   : > { %v1624_v30 = vpop.f32.mrf.mxu0  ;;  %v1665_v31 = vpop.f32.mrf.mxu1 }
 0x1b9   : > { %v1671_v4 = vadd.f32 %v1624_v30, %v1561_v23  ;;  %v1673_v6 = vadd.f32 %v1665_v31, %v1563_v24 }
 0x1ba   : > { %v1626_v32 = vpop.f32.mrf.mxu0  ;;  %v3593_v33 = vpop.f32.mrf.mxu1 }
 0x1bb   : > { %v1672_v34 = vadd.f32 %v1626_v32, %v1562_v26 }
 0x1bc   : > { %v1628_v35 = vpop.f32.mrf.mxu0  ;;  %v1668_v36 = vpop.f32.mrf.mxu1 }
 0x1be   : > { %v1629_v37 = vpop.f32.mrf.mxu0  ;;  %v3594_v38 = vpop.f32.mrf.mxu1 }
 0x1c0   : > { %v1713_v39 = vpop.f32.mrf.mxu0  ;;  %v1754_v40 = vpop.f32.mrf.mxu1 }
 0x1c1   : > { %v1760_v41 = vadd.f32 %v1713_v39, %v1671_v4  ;;  %v1762_v42 = vadd.f32 %v1754_v40, %v1673_v6 }
 0x1c2   : > { %v1715_v43 = vpop.f32.mrf.mxu0  ;;  %v3599_v44 = vpop.f32.mrf.mxu1 }
 0x1c3   : > { %v1761_v45 = vadd.f32 %v1715_v43, %v1672_v34 }
 0x1c4   : > { %v1717_v46 = vpop.f32.mrf.mxu0  ;;  %v1757_v47 = vpop.f32.mrf.mxu1 }
 0x1c6   : > { %v1718_v48 = vpop.f32.mrf.mxu0  ;;  %v3600_v1 = vpop.f32.mrf.mxu1 }
 0x1c8   : > { %v1823_v49 = vpop.f32.mrf.mxu0  ;;  %v1864_v50 = vpop.f32.mrf.mxu1 }
 0x1c9   : > { %v1870_v0 = vadd.f32 %v1823_v49, %v1760_v41  ;;  %v1872_v51 = vadd.f32 %v1864_v50, %v1762_v42 }
 0x1ca   : > { %v1825_v52 = vpop.f32.mrf.mxu0  ;;  %v3605_v53 = vpop.f32.mrf.mxu1 }
 0x1cb   : > { %v1871_v54 = vadd.f32 %v1825_v52, %v1761_v45 }
 0x1cc   : > { %v1827_v9 = vpop.f32.mrf.mxu0  ;;  %v1867_v10 = vpop.f32.mrf.mxu1 }
 0x1ce   : > { %v1828_v59 = vpop.f32.mrf.mxu0  ;;  %v3606_v55 = vpop.f32.mrf.mxu1 }
 0x1d0   : > { %v1945_v56 = vpop.f32.mrf.mxu0  ;;  %v1986_v57 = vpop.f32.mrf.mxu1 }
 0x1d1   : > { %v4429_v61 = vadd.f32 %v1945_v56, %v1870_v0  ;;  %v4431_v62 = vadd.f32 %v1986_v57, %v1872_v51 }
 0x1d2   : > { %v1947_v12 = vpop.f32.mrf.mxu0  ;;  %v3611_v13 = vpop.f32.mrf.mxu1 }
 0x1d3   : > { %v4433_v58 = vadd.f32 %v1947_v12, %v1871_v54 }
 0x1d4   : > { %v1949_v60 = vpop.f32.mrf.mxu0  ;;  %v1989_v63 = vpop.f32.mrf.mxu1 }
 0x1d6   : > { %v1950_v2 = vpop.f32.mrf.mxu0  ;;  %v3612_v3 = vpop.f32.mrf.mxu1 }
 0x1d8   : > { %v2055_v8 = vpop.f32.mrf.mxu0  ;;  %v2096_v11 = vpop.f32.mrf.mxu1 }
 0x1da   : > { %v4435_v14 = vpop.f32.mrf.mxu0  ;;  %v3617_v15 = vpop.f32.mrf.mxu1 }
 0x1dc   : > { %v2059_v16 = vpop.f32.mrf.mxu0  ;;  %v2099_v17 = vpop.f32.mrf.mxu1 }
 0x1dd   : > { %v2102_v16 = vadd.f32 %v2055_v8, %v4429_v61  ;;  %v2104_v17 = vadd.f32 %v2096_v11, %v4431_v62 }
 0x1de   : > { %v2060_v18 = vpop.f32.mrf.mxu0  ;;  %v3618_v19 = vpop.f32.mrf.mxu1 }
 0x1e0   : > { %v2165_v20 = vpop.f32.mrf.mxu0  ;;  %v2206_v21 = vpop.f32.mrf.mxu1 }
 0x1e2   : > { %v2167_v22 = vpop.f32.mrf.mxu0  ;;  %v3623_v23 = vpop.f32.mrf.mxu1 }
 0x1e3   : > { %v2103_v23 = vadd.f32 %v4435_v14, %v4433_v58 }
 0x1e4   : > { %v2169_v24 = vpop.f32.mrf.mxu0  ;;  %v2209_v7 = vpop.f32.mrf.mxu1 }
 0x1e5   : > { %v2212_v24 = vadd.f32 %v2165_v20, %v2102_v16  ;;  %v2214_v7 = vadd.f32 %v2206_v21, %v2104_v17 }
 0x1e6   : > { %v2170_v25 = vpop.f32.mrf.mxu0  ;;  %v3624_v26 = vpop.f32.mrf.mxu1 }
 0x1e8   : > { %v2273_v5 = vpop.f32.mrf.mxu0  ;;  %v2314_v27 = vpop.f32.mrf.mxu1 }
 0x1ea   : > { %v2275_v28 = vpop.f32.mrf.mxu0  ;;  %v3629_v29 = vpop.f32.mrf.mxu1 }
 0x1eb   : > { %v2213_v29 = vadd.f32 %v2167_v22, %v2103_v23 }
 0x1ec   : > { %v2277_v30 = vpop.f32.mrf.mxu0  ;;  %v2317_v31 = vpop.f32.mrf.mxu1 }
 0x1ed   : > { %v2320_v30 = vadd.f32 %v2273_v5, %v2212_v24  ;;  %v2322_v31 = vadd.f32 %v2314_v27, %v2214_v7 }
 0x1ee   : > { %v2278_v4 = vpop.f32.mrf.mxu0  ;;  %v3630_v6 = vpop.f32.mrf.mxu1 }
 0x1f0   : > { %v2383_v32 = vpop.f32.mrf.mxu0  ;;  %v2424_v33 = vpop.f32.mrf.mxu1 }
 0x1f2   : > { %v2385_v34 = vpop.f32.mrf.mxu0  ;;  %v3635_v35 = vpop.f32.mrf.mxu1 }
 0x1f3   : > { %v2321_v35 = vadd.f32 %v2275_v28, %v2213_v29 }
 0x1f4   : > { %v2387_v36 = vpop.f32.mrf.mxu0  ;;  %v2427_v37 = vpop.f32.mrf.mxu1 }
 0x1f5   : > { %v2430_v36 = vadd.f32 %v2383_v32, %v2320_v30  ;;  %v2432_v37 = vadd.f32 %v2424_v33, %v2322_v31  ;;  %v2431_v62 = vadd.f32 %v2385_v34, %v2321_v35 }
 0x1f6   : > { %v2388_v38 = vpop.f32.mrf.mxu0  ;;  %v3636_v39 = vpop.f32.mrf.mxu1 }
 0x1f8   : > { %v2493_v40 = vpop.f32.mrf.mxu0  ;;  %v2534_v41 = vpop.f32.mrf.mxu1 }
 0x1f9   : > { %v2540_v11 = vadd.f32 %v2493_v40, %v2430_v36  ;;  %v2542_v38 = vadd.f32 %v2534_v41, %v2432_v37 }
 0x1fa   : > { %v2495_v42 = vpop.f32.mrf.mxu0  ;;  %v3641_v43 = vpop.f32.mrf.mxu1 }
 0x1fb   : > { %v2541_v14 = vadd.f32 %v2495_v42, %v2431_v62 }
 0x1fc   : > { %v2497_v44 = vpop.f32.mrf.mxu0  ;;  %v2537_v45 = vpop.f32.mrf.mxu1 }
 0x1fe   : > { %v2498_v46 = vpop.f32.mrf.mxu0  ;;  %v3642_v47 = vpop.f32.mrf.mxu1 }
 0x200   : > { %v2603_v48 = vpop.f32.mrf.mxu0  ;;  %v2644_v1 = vpop.f32.mrf.mxu1 }
 0x201   : > { %v2650_v20 = vadd.f32 %v2603_v48, %v2540_v11  ;;  %v2652_v21 = vadd.f32 %v2644_v1, %v2542_v38 }
 0x202   : > { %v2605_v49 = vpop.f32.mrf.mxu0  ;;  %v3647_v50 = vpop.f32.mrf.mxu1 }
 0x203   : > { %v2651_v5 = vadd.f32 %v2605_v49, %v2541_v14 }
 0x204   : > { %v2607_v0 = vpop.f32.mrf.mxu0  ;;  %v2647_v51 = vpop.f32.mrf.mxu1 }
 0x205   : > { %v3190_v51 = vpop.permute.xlu0 %3189 }
 0x206   : > { %v2608_v52 = vpop.f32.mrf.mxu0  ;;  %v3648_v53 = vpop.f32.mrf.mxu1 }
 0x208   : > { %v2692_v54 = vpop.f32.mrf.mxu0  ;;  %v2733_v9 = vpop.f32.mrf.mxu1 }
 0x209   : > { %v2739_v27 = vadd.f32 %v2692_v54, %v2650_v20  ;;  %v2741_v44 = vadd.f32 %v2733_v9, %v2652_v21 }
 0x20a   : > { %v2694_v10 = vpop.f32.mrf.mxu0  ;;  %v3653_v59 = vpop.f32.mrf.mxu1 }
 0x20b   : > { %v2740_v33 = vadd.f32 %v2694_v10, %v2651_v5 }
 0x20c   : > { %v2696_v55 = vpop.f32.mrf.mxu0  ;;  %v2736_v56 = vpop.f32.mrf.mxu1 }
 0x20e   : > { %v2697_v57 = vpop.f32.mrf.mxu0  ;;  %v3654_v12 = vpop.f32.mrf.mxu1 }
 0x210   : > { %v2802_v13 = vpop.f32.mrf.mxu0  ;;  %v2843_v60 = vpop.f32.mrf.mxu1 }
 0x211   : > { %v2849_v45 = vadd.f32 %v2802_v13, %v2739_v27  ;;  %v2851_v46 = vadd.f32 %v2843_v60, %v2741_v44 }
 0x212   : > { %v2804_v63 = vpop.f32.mrf.mxu0  ;;  %v3659_v2 = vpop.f32.mrf.mxu1 }
 0x213   : > { %v2850_v41 = vadd.f32 %v2804_v63, %v2740_v33 }
 0x214   : > { %v2806_v3 = vpop.f32.mrf.mxu0  ;;  %v2846_v15 = vpop.f32.mrf.mxu1 }
 0x216   : > { %v2807_v18 = vpop.f32.mrf.mxu0  ;;  %v3660_v19 = vpop.f32.mrf.mxu1 }
 0x218   : > { %v2912_v25 = vpop.f32.mrf.mxu0  ;;  %v2953_v26 = vpop.f32.mrf.mxu1 }
 0x219   : > { %v2959_v47 = vadd.f32 %v2912_v25, %v2849_v45  ;;  %v2961_v50 = vadd.f32 %v2953_v26, %v2851_v46 }
 0x21a   : > { %v2914_v4 = vpop.f32.mrf.mxu0  ;;  %v3665_v6 = vpop.f32.mrf.mxu1 }
 0x21b   : > { %v2960_v1 = vadd.f32 %v2914_v4, %v2850_v41 }
 0x21c   : > { %v2916_v61 = vpop.f32.mrf.mxu0  ;;  %v2956_v8 = vpop.f32.mrf.mxu1 }
 0x21e   : > { %v2917_v39 = vpop.f32.mrf.mxu0  ;;  %v3666_v58 = vpop.f32.mrf.mxu1 }
 0x220   : > { %v3022_v43 = vpop.f32.mrf.mxu0  ;;  %v3063_v22 = vpop.f32.mrf.mxu1 }
 0x221   : > { %v3069_v49 = vadd.f32 %v3022_v43, %v2959_v47  ;;  %v3071_v0 = vadd.f32 %v3063_v22, %v2961_v50 }
 0x222   : > { %v3024_v28 = vpop.f32.mrf.mxu0  ;;  %v3671_v32 = vpop.f32.mrf.mxu1 }
 0x223   : > { %v3070_v54 = vadd.f32 %v3024_v28, %v2960_v1 }
 0x224   : > { %v3026_v34 = vpop.f32.mrf.mxu0  ;;  %v3066_v40 = vpop.f32.mrf.mxu1 }
 0x226   : > { %v3027_v42 = vpop.f32.mrf.mxu0  ;;  %v3672_v48 = vpop.f32.mrf.mxu1 }
 0x228   : > { %v3132_v52 = vpop.f32.mrf.mxu0  ;;  %v3173_v53 = vpop.f32.mrf.mxu1 }
 0x229   : > { %v3179_v9 = vadd.f32 %v3132_v52, %v3069_v49  ;;  %v3181_v10 = vadd.f32 %v3173_v53, %v3071_v0 }
 0x22a   : > { %v3134_v59 = vpop.f32.mrf.mxu0  ;;  %v3677_v55 = vpop.f32.mrf.mxu1 }
 0x22b   : > { %v3180_v56 = vadd.f32 %v3134_v59, %v3070_v54  ;;  %v3194_v57 = vadd.f32 %v3190_v51, %v3181_v10  ;;  %v3192_v60 = vadd.f32 %v3190_v51, %v3179_v9 }
 0x22c   : > { %v3136_v12 = vpop.f32.mrf.mxu0  ;;  %v3176_v13 = vpop.f32.mrf.mxu1 }
 0x22d   : > { %v3193_v63 = vadd.f32 %v3190_v51, %v3180_v56  ;;  %3200 = vst [vmem:[%s217_s5 + $0x8] sm:$0xf] %v3194_v57 }
 0x22e   : > { %v3137_v2 = vpop.f32.mrf.mxu0  ;;  %v3678_v3 = vpop.f32.mrf.mxu1 }
 0x22f   : > { %v3197_v15 = vcombine.low %v3192_v60, %v3193_v63 }
 0x231   : > { %3199 = vst [vmem:[%s217_s5] sm:$0xff] %v3197_v15 }
 0x232   : > { %3787 = shalt.err (!%p3784_p5)
}
 0x233   : > { %s3788_s21 = scalar_lea.hbm %s3230_s9, 192  ;;  %s3792_s26 = scalar_lea.hbm %s4487_s3, 384 }
 0x234   : > { %p3789_p6 = scmp.ne.s32.totalorder %s3230_s9, %s3788_s21  ;;  %p3793_p10 = scmp.lt.s32.totalorder %s3230_s9, %s4487_s3 }
 0x235   : > { %p3794_p11 = scmp.lt.s32.totalorder %s3792_s26, %s3788_s21 }
 0x236   : > { %p3790_p7 = pnand %p3789_p6, %p3940_p4 }
 0x237   : > { %p3795_p12 = por %p3794_p11, %p3793_p10 }
 0x238   : > { %p3791_p9 = pneg %p3790_p7 }
 0x23a   : > { %p3796_p13 = pnand %p3795_p12, %p3791_p9 }
 0x23c   : > { %3799 = shalt.err (!%p3796_p13)
}
 0x23d   : > { %3682 = dma.vmem_to_hbm [thread:$0]  (%p3940_p4), %s3233_s6, 192, %s3230_s9, %s3216_s10  }
 0x23e PF: > { %p3688_p0 = scmp.ge.s32.totalorder %s3850_s17, 2  ;;  %s3244_s29 = sand.u32 1, %s3830_s12  }
 0x23f   : > { %s3245_s4 = scalar_lea.sflag [#allocation3], %s3244_s29 }
 0x240   : > { %p3685_p1 = pnand %p3688_p0, %p3947_p8 }
 0x242   : > { %p3686_p2 = pneg %p3685_p1 }
 0x244   : > { %3825 = dma.done.wait (%p3686_p2), %s3245_s4, 192  }
 0x245   : > { %3827 = vsyncadd (%p3686_p2), %s3245_s4, 4294967104  ;;  %s16_s17 = sadd.s32 1, %s3850_s17   ;;  %s4490_s12 = smov %s3834_s13 }
 0x246   : > { %p13_p3 = scmp.ge.s32.totalorder %s16_s17, 4   ;;  %s4491_s13 = smov %s3838_s14 }
 0x247   : > { %s4492_s14 = smov %s3953_s25  ;;  %s4493_s15 = smov %s3846_s16 }
 0x248   : > { %s4494_s16 = smov %s4496_s20  ;;  %15 = sbr.rel (!%p13_p3) target bundleno = 4 (0x4), region = 104 }
 0x24d   :  { %3250 = vsyncpa [#allocation3], 1 }
 0x24e   :  { %3252 = vsyncpa [#allocation3 + $0x1], 1 }

</bundles_post_ra>
